<compile_context>
chip_gen: v7x
topology: tpu7x:2x2x1
jax: 0.10.0
libtpu: 0.0.40
codegen_flags: <defaults>
</compile_context>

<pallas_src>
import functools

import jax
import jax.numpy as jnp
from jax.experimental import pallas as pl
from jax.experimental.pallas import tpu as pltpu


def _round_up(n, m):
    return ((n + m - 1) // m) * m


# ----------------------------------------------------------------------------
# Kernel: common (3x Linear+ReLU) -> fc (NoisyLinear+ReLU, NoisyLinear)
# Biases arrive packed in one (8, W) f32 slab, one sublane row per layer.
# ----------------------------------------------------------------------------
def _make_kernel(widths):
    def kernel(x_ref, w1_ref, w2_ref, w3_ref, w4_ref, w5_ref, bias_ref, out_ref):
        def dense(h_bf16, w_ref, layer):
            # bf16 x bf16 -> f32 accumulation on the MXU, bias add in f32.
            b = bias_ref[layer:layer + 1, :widths[layer]]          # static slice
            return (jnp.dot(h_bf16, w_ref[...],
                            preferred_element_type=jnp.float32) + b)

        h = x_ref[...]                                             # [TB, K_pad] bf16
        h = jnp.maximum(dense(h, w1_ref, 0), 0.0).astype(jnp.bfloat16)  # common[0]
        h = jnp.maximum(dense(h, w2_ref, 1), 0.0).astype(jnp.bfloat16)  # common[2]
        h = jnp.maximum(dense(h, w3_ref, 2), 0.0).astype(jnp.bfloat16)  # common[4]
        h = jnp.maximum(dense(h, w4_ref, 3), 0.0).astype(jnp.bfloat16)  # fc[0] noisy
        out_ref[...] = dense(h, w5_ref, 4)                              # fc[2] noisy

    return kernel


# ----------------------------------------------------------------------------
# Parameter init mirroring the PyTorch module (weights stored as [in, out]).
# ----------------------------------------------------------------------------
def init_params(key, in_shape, n_actions, quant, sigma_init=0.017):
    def linear(key, fan_in, fan_out):
        kw, kb = jax.random.split(key)
        bound = 1.0 / jnp.sqrt(fan_in)
        w = jax.random.uniform(kw, (fan_in, fan_out), jnp.float32, -bound, bound)
        b = jax.random.uniform(kb, (1, fan_out), jnp.float32, -bound, bound)
        return w, b

    def noisy_linear(key, fan_in, fan_out):
        kw, kb = jax.random.split(key)
        std = jnp.sqrt(3.0 / fan_in)
        w = jax.random.uniform(kw, (fan_in, fan_out), jnp.float32, -std, std)
        b = jax.random.uniform(kb, (1, fan_out), jnp.float32, -std, std)
        sigma_w = jnp.full((fan_in, fan_out), sigma_init, jnp.float32)
        sigma_b = jnp.full((1, fan_out), sigma_init, jnp.float32)
        return w, b, sigma_w, sigma_b

    k1, k2, k3, k4, k5 = jax.random.split(key, 5)
    linear_params = (linear(k1, in_shape, 128),
                     linear(k2, 128, 256),
                     linear(k3, 256, 256))
    noisy_params = (noisy_linear(k4, 256, 512),
                    noisy_linear(k5, 512, quant * n_actions))
    return linear_params, noisy_params


# ----------------------------------------------------------------------------
# One-time prep: pad + cast static layers, pre-cast noisy bases; done at init,
# NOT per forward (perf review item 1).
# ----------------------------------------------------------------------------
def prepare_static(params, in_shape, n_actions, quant):
    (w1, b1), (w2, b2), (w3, b3) = params[0]
    (w4, b4, sw4, sb4), (w5, b5, sw5, sb5) = params[1]

    out_dim = quant * n_actions
    k_pad = _round_up(in_shape, 128)       # lane-dense contraction for layer 1
    out_pad = _round_up(out_dim, 128)      # lane-dense final output
    bias_w = max(512, out_pad)

    w1p = jnp.zeros((k_pad, w1.shape[1]), jnp.bfloat16).at[:in_shape, :].set(
        w1.astype(jnp.bfloat16))
    w2b = w2.astype(jnp.bfloat16)
    w3b = w3.astype(jnp.bfloat16)

    # Noisy-layer bases pre-cast (bf16) and pre-padded; sigma padding is zero
    # so the padded output columns of the folded w5 stay exactly zero.
    w4b = w4.astype(jnp.bfloat16)
    sw4b = sw4.astype(jnp.bfloat16)
    w5p = jnp.zeros((w5.shape[0], out_pad), jnp.bfloat16).at[:, :out_dim].set(
        w5.astype(jnp.bfloat16))
    sw5p = jnp.zeros((w5.shape[0], out_pad), jnp.bfloat16).at[:, :out_dim].set(
        sw5.astype(jnp.bfloat16))

    # Bias slab: one sublane row per layer, zero padded. Rows 3/4 are the
    # noisy layers and get overwritten with the folded biases per forward.
    bias_base = jnp.zeros((8, bias_w), jnp.float32)
    bias_base = bias_base.at[0, :b1.shape[1]].set(b1[0].astype(jnp.float32))
    bias_base = bias_base.at[1, :b2.shape[1]].set(b2[0].astype(jnp.float32))
    bias_base = bias_base.at[2, :b3.shape[1]].set(b3[0].astype(jnp.float32))

    static_arrays = (w1p, w2b, w3b, bias_base)
    noisy_base = (w4b, sw4b, b4.astype(jnp.float32), sb4.astype(jnp.float32),
                  w5p, sw5p, b5.astype(jnp.float32), sb5.astype(jnp.float32))
    return static_arrays, noisy_base


# ----------------------------------------------------------------------------
# Per-forward NoisyLinear fold (independent Gaussian noise, as in the PyTorch
# module), done against bf16 base weights; fuses under the forward jit.
# ----------------------------------------------------------------------------
def fold_noise(noisy_base, noise_key):
    w4b, sw4b, b4, sb4, w5p, sw5p, b5, sb5 = noisy_base
    k1, k2, k3, k4 = jax.random.split(noise_key, 4)
    eps_w4 = jax.random.normal(k1, w4b.shape, jnp.float32)
    eps_b4 = jax.random.normal(k2, b4.shape, jnp.float32)
    eps_w5 = jax.random.normal(k3, w5p.shape, jnp.float32)
    eps_b5 = jax.random.normal(k4, b5.shape, jnp.float32)
    w4_eff = (w4b.astype(jnp.float32)
              + sw4b.astype(jnp.float32) * eps_w4).astype(jnp.bfloat16)
    w5_eff = (w5p.astype(jnp.float32)
              + sw5p.astype(jnp.float32) * eps_w5).astype(jnp.bfloat16)
    b4_eff = b4 + sb4 * eps_b4
    b5_eff = b5 + sb5 * eps_b5
    return w4_eff, w5_eff, b4_eff, b5_eff


# ----------------------------------------------------------------------------
# Batch-tile selection (perf review: adaptive tb, multiple of 16).
# ----------------------------------------------------------------------------
def _pick_tb(batch, tb):
    if tb is not None:
        if tb % 16 != 0:
            raise ValueError("tb must be a multiple of 16 (bf16 sublane packing)")
        return tb
    if batch <= 256:
        # Two balanced batch tiles: both v7x TensorCores busy, <1 tile of
        # padded rows, negligible extra grid-step cost on v5e/v6e.
        return max(16, _round_up((batch + 1) // 2, 16))
    return 128   # v5e-safe default; sweep 256 on v6e/v7x for very large B.


# ----------------------------------------------------------------------------
# Pallas call
# ----------------------------------------------------------------------------
def _rainbow_mlp_pallas(xp, w1p, w2b, w3b, w4_eff, w5_eff, bias_slab, out_pad, tb):
    b_pad, k_pad = xp.shape
    widths = (w1p.shape[1], w2b.shape[1], w3b.shape[1], w4_eff.shape[1], out_pad)
    kernel = _make_kernel(widths)

    def resident(shape):
        # Constant block index -> stays VMEM-resident across the batch grid.
        return pl.BlockSpec(shape, lambda i: (0,) * len(shape))

    grid = (b_pad // tb,)
    return pl.pallas_call(
        kernel,
        out_shape=jax.ShapeDtypeStruct((b_pad, out_pad), jnp.float32),
        grid=grid,
        in_specs=[
            pl.BlockSpec((tb, k_pad), lambda i: (i, 0)),     # x: batch-tiled
            resident(w1p.shape), resident(w2b.shape), resident(w3b.shape),
            resident(w4_eff.shape), resident(w5_eff.shape),
            resident(bias_slab.shape),
        ],
        out_specs=pl.BlockSpec((tb, out_pad), lambda i: (i, 0)),
        compiler_params=pltpu.CompilerParams(
            dimension_semantics=("parallel",),   # v7x: shard batch over 2 TCs
            vmem_limit_bytes=16 << 20,           # ~2 MiB actual footprint
        ),
    )(xp, w1p, w2b, w3b, w4_eff, w5_eff, bias_slab)


# ----------------------------------------------------------------------------
# Forward: fold noise (bf16), pad x, run kernel, slice + reshape. One jit so
# the per-forward glue fuses and dispatches once.
# ----------------------------------------------------------------------------
@functools.partial(jax.jit, static_argnames=("n_actions", "quant", "tb"))
def rainbow_dqn_forward(x, static_arrays, noisy_base, noise_key,
                        *, n_actions, quant, tb=None):
    w1p, w2b, w3b, bias_base = static_arrays
    out_dim = quant * n_actions
    out_pad = _round_up(out_dim, 128)
    k_pad = w1p.shape[0]

    B, K = x.shape
    tb = _pick_tb(B, tb)
    b_pad = _round_up(B, tb)

    # Per-forward NoisyLinear fold (the only weight work that changes per call).
    w4_eff, w5_eff, b4_eff, b5_eff = fold_noise(noisy_base, noise_key)
    bias_slab = (bias_base
                 .at[3, :b4_eff.shape[1]].set(b4_eff[0])
                 .at[4, :out_dim].set(b5_eff[0]))

    xp = jnp.zeros((b_pad, k_pad), jnp.bfloat16).at[:B, :K].set(
        x.astype(jnp.bfloat16))

    flat = _rainbow_mlp_pallas(xp, w1p, w2b, w3b, w4_eff, w5_eff, bias_slab,
                               out_pad, tb)
    # Keep the padding slice adjacent to the pallas_call (padded rows/cols are
    # garbage/zero); then theta = x.view(-1, n_actions, quant).
    return flat[:B, :out_dim].reshape(B, n_actions, quant)


# ----------------------------------------------------------------------------
# Pure-JAX reference with identical numerics (same folded bf16 weights,
# bf16 matmul inputs, f32 accumulation).
# ----------------------------------------------------------------------------
def reference_forward(x, static_arrays, noisy_base, noise_key, *, n_actions, quant):
    w1p, w2b, w3b, bias_base = static_arrays
    out_dim = quant * n_actions
    w4_eff, w5_eff, b4_eff, b5_eff = fold_noise(noisy_base, noise_key)
    bias = (bias_base
            .at[3, :b4_eff.shape[1]].set(b4_eff[0])
            .at[4, :out_dim].set(b5_eff[0]))

    B, K = x.shape
    k_pad = w1p.shape[0]
    xp = jnp.zeros((B, k_pad), jnp.bfloat16).at[:, :K].set(x.astype(jnp.bfloat16))

    ws = (w1p, w2b, w3b, w4_eff, w5_eff)
    h = xp
    for i, w in enumerate(ws):
        a = (jnp.dot(h, w, preferred_element_type=jnp.float32)
             + bias[i:i + 1, :w.shape[1]])
        h = jnp.maximum(a, 0.0).astype(jnp.bfloat16) if i < len(ws) - 1 else a
    return h[:, :out_dim].reshape(B, n_actions, quant)


if __name__ == "__main__":
    in_shape = 32
    n_actions = 4
    quant = 8
    batch = 200  # deliberately not a multiple of the batch tile

    key = jax.random.PRNGKey(0)
    kx, kp, kn = jax.random.split(key, 3)
    x = jax.random.normal(kx, (batch, in_shape), jnp.float32)

    params = init_params(kp, in_shape, n_actions, quant)
    # One-time static prep (hoisted out of the forward).
    static_arrays, noisy_base = prepare_static(params, in_shape, n_actions, quant)

    theta = rainbow_dqn_forward(x, static_arrays, noisy_base, kn,
                                n_actions=n_actions, quant=quant)
    theta = jax.block_until_ready(theta)

    ref = reference_forward(x, static_arrays, noisy_base, kn,
                            n_actions=n_actions, quant=quant)
    assert theta.shape == (batch, n_actions, quant), theta.shape
    assert jnp.allclose(theta, ref, atol=1e-2, rtol=1e-2), "mismatch vs JAX reference"

    print("KERNEL_OK")
</pallas_src>

<mosaic_0001>
module attributes {stable_mosaic.version = 11 : i64} {
  func.func @kernel(%arg0: i32, %arg1: memref<112x128xbf16, #tpu.memory_space<vmem>>, %arg2: memref<128x128xbf16, #tpu.memory_space<vmem>>, %arg3: memref<128x256xbf16, #tpu.memory_space<vmem>>, %arg4: memref<256x256xbf16, #tpu.memory_space<vmem>>, %arg5: memref<256x512xbf16, #tpu.memory_space<vmem>>, %arg6: memref<512x128xbf16, #tpu.memory_space<vmem>>, %arg7: memref<8x512xf32, #tpu.memory_space<vmem>>, %arg8: memref<112x128xf32, #tpu.memory_space<vmem>>) attributes {dimension_semantics = [#tpu.dimension_semantics<parallel>], iteration_bounds = array<i64: 2>, scalar_prefetch = 0 : i64, scratch_operands = 0 : i64, tpu.core_type = #tpu.core_type<tc>, window_params = [{transform_indices = @transform_0, window_bounds = array<i64: 112, 128>}, {pipeline_mode = #tpu.pipeline_mode<synchronous>, transform_indices = @transform_1, window_bounds = array<i64: 128, 128>}, {pipeline_mode = #tpu.pipeline_mode<synchronous>, transform_indices = @transform_2, window_bounds = array<i64: 128, 256>}, {pipeline_mode = #tpu.pipeline_mode<synchronous>, transform_indices = @transform_3, window_bounds = array<i64: 256, 256>}, {pipeline_mode = #tpu.pipeline_mode<synchronous>, transform_indices = @transform_4, window_bounds = array<i64: 256, 512>}, {pipeline_mode = #tpu.pipeline_mode<synchronous>, transform_indices = @transform_5, window_bounds = array<i64: 512, 128>}, {pipeline_mode = #tpu.pipeline_mode<synchronous>, transform_indices = @transform_6, window_bounds = array<i64: 8, 512>}, {transform_indices = @transform_7, window_bounds = array<i64: 112, 128>}]} {
    %c0 = arith.constant 0 : index
    %c0_0 = arith.constant 0 : index
    %0 = vector.load %arg1[%c0, %c0_0] : memref<112x128xbf16, #tpu.memory_space<vmem>>, vector<112x128xbf16>
    %c0_1 = arith.constant 0 : index
    %c0_2 = arith.constant 0 : index
    %1 = vector.load %arg7[%c0_1, %c0_2] : memref<8x512xf32, #tpu.memory_space<vmem>>, vector<1x128xf32>
    %c0_3 = arith.constant 0 : index
    %c0_4 = arith.constant 0 : index
    %2 = vector.load %arg2[%c0_3, %c0_4] : memref<128x128xbf16, #tpu.memory_space<vmem>>, vector<128x128xbf16>
    %cst = arith.constant dense<0.000000e+00> : vector<112x128xf32>
    %3 = tpu.matmul %0, %2, %cst {dimension_numbers = #tpu.dot_dimension_numbers<[1], [0], [0], [1], [0, 0, 1, 1], [], []>} : vector<112x128xbf16>, vector<128x128xbf16>, vector<112x128xf32> -> vector<112x128xf32>
    %4 = vector.broadcast %1 : vector<1x128xf32> to vector<112x128xf32>
    %5 = arith.addf %3, %4 : vector<112x128xf32>
    %cst_5 = arith.constant 0.000000e+00 : f32
    %6 = vector.broadcast %cst_5 : f32 to vector<112x128xf32>
    %7 = arith.maximumf %5, %6 : vector<112x128xf32>
    %8 = arith.truncf %7 : vector<112x128xf32> to vector<112x128xbf16>
    %c1 = arith.constant 1 : index
    %c0_6 = arith.constant 0 : index
    %9 = vector.load %arg7[%c1, %c0_6] : memref<8x512xf32, #tpu.memory_space<vmem>>, vector<1x256xf32>
    %c0_7 = arith.constant 0 : index
    %c0_8 = arith.constant 0 : index
    %10 = vector.load %arg3[%c0_7, %c0_8] : memref<128x256xbf16, #tpu.memory_space<vmem>>, vector<128x256xbf16>
    %cst_9 = arith.constant dense<0.000000e+00> : vector<112x256xf32>
    %11 = tpu.matmul %8, %10, %cst_9 {dimension_numbers = #tpu.dot_dimension_numbers<[1], [0], [0], [1], [0, 0, 1, 1], [], []>} : vector<112x128xbf16>, vector<128x256xbf16>, vector<112x256xf32> -> vector<112x256xf32>
    %12 = vector.broadcast %9 : vector<1x256xf32> to vector<112x256xf32>
    %13 = arith.addf %11, %12 : vector<112x256xf32>
    %cst_10 = arith.constant 0.000000e+00 : f32
    %14 = vector.broadcast %cst_10 : f32 to vector<112x256xf32>
    %15 = arith.maximumf %13, %14 : vector<112x256xf32>
    %16 = arith.truncf %15 : vector<112x256xf32> to vector<112x256xbf16>
    %c2 = arith.constant 2 : index
    %c0_11 = arith.constant 0 : index
    %17 = vector.load %arg7[%c2, %c0_11] : memref<8x512xf32, #tpu.memory_space<vmem>>, vector<1x256xf32>
    %c0_12 = arith.constant 0 : index
    %c0_13 = arith.constant 0 : index
    %18 = vector.load %arg4[%c0_12, %c0_13] : memref<256x256xbf16, #tpu.memory_space<vmem>>, vector<256x256xbf16>
    %cst_14 = arith.constant dense<0.000000e+00> : vector<112x256xf32>
    %19 = tpu.matmul %16, %18, %cst_14 {dimension_numbers = #tpu.dot_dimension_numbers<[1], [0], [0], [1], [0, 0, 1, 1], [], []>} : vector<112x256xbf16>, vector<256x256xbf16>, vector<112x256xf32> -> vector<112x256xf32>
    %20 = vector.broadcast %17 : vector<1x256xf32> to vector<112x256xf32>
    %21 = arith.addf %19, %20 : vector<112x256xf32>
    %cst_15 = arith.constant 0.000000e+00 : f32
    %22 = vector.broadcast %cst_15 : f32 to vector<112x256xf32>
    %23 = arith.maximumf %21, %22 : vector<112x256xf32>
    %24 = arith.truncf %23 : vector<112x256xf32> to vector<112x256xbf16>
    %c3 = arith.constant 3 : index
    %c0_16 = arith.constant 0 : index
    %25 = vector.load %arg7[%c3, %c0_16] : memref<8x512xf32, #tpu.memory_space<vmem>>, vector<1x512xf32>
    %c0_17 = arith.constant 0 : index
    %c0_18 = arith.constant 0 : index
    %26 = vector.load %arg5[%c0_17, %c0_18] : memref<256x512xbf16, #tpu.memory_space<vmem>>, vector<256x512xbf16>
    %cst_19 = arith.constant dense<0.000000e+00> : vector<112x512xf32>
    %27 = tpu.matmul %24, %26, %cst_19 {dimension_numbers = #tpu.dot_dimension_numbers<[1], [0], [0], [1], [0, 0, 1, 1], [], []>} : vector<112x256xbf16>, vector<256x512xbf16>, vector<112x512xf32> -> vector<112x512xf32>
    %28 = vector.broadcast %25 : vector<1x512xf32> to vector<112x512xf32>
    %29 = arith.addf %27, %28 : vector<112x512xf32>
    %cst_20 = arith.constant 0.000000e+00 : f32
    %30 = vector.broadcast %cst_20 : f32 to vector<112x512xf32>
    %31 = arith.maximumf %29, %30 : vector<112x512xf32>
    %32 = arith.truncf %31 : vector<112x512xf32> to vector<112x512xbf16>
    %c4 = arith.constant 4 : index
    %c0_21 = arith.constant 0 : index
    %33 = vector.load %arg7[%c4, %c0_21] : memref<8x512xf32, #tpu.memory_space<vmem>>, vector<1x128xf32>
    %c0_22 = arith.constant 0 : index
    %c0_23 = arith.constant 0 : index
    %34 = vector.load %arg6[%c0_22, %c0_23] : memref<512x128xbf16, #tpu.memory_space<vmem>>, vector<512x128xbf16>
    %cst_24 = arith.constant dense<0.000000e+00> : vector<112x128xf32>
    %35 = tpu.matmul %32, %34, %cst_24 {dimension_numbers = #tpu.dot_dimension_numbers<[1], [0], [0], [1], [0, 0, 1, 1], [], []>} : vector<112x512xbf16>, vector<512x128xbf16>, vector<112x128xf32> -> vector<112x128xf32>
    %36 = vector.broadcast %33 : vector<1x128xf32> to vector<112x128xf32>
    %37 = arith.addf %35, %36 : vector<112x128xf32>
    %c0_25 = arith.constant 0 : index
    %c0_26 = arith.constant 0 : index
    %38 = vector.load %arg8[%c0_25, %c0_26] : memref<112x128xf32, #tpu.memory_space<vmem>>, vector<112x128xf32>
    tpu.vector_store %arg8[%c0_25, %c0_26], %37 {strides = array<i32>} : memref<112x128xf32, #tpu.memory_space<vmem>>, vector<112x128xf32>,
    return
  }
  func.func @transform_0(%arg0: i32) -> (i32, i32) {
    %c0_i32 = arith.constant 0 : i32
    %c0_i32_0 = arith.constant 0 : i32
    return %arg0, %c0_i32 : i32, i32
  }
  func.func @transform_1(%arg0: i32) -> (i32, i32) {
    %c0_i32 = arith.constant 0 : i32
    %c0_i32_0 = arith.constant 0 : i32
    %c0_i32_1 = arith.constant 0 : i32
    return %c0_i32, %c0_i32_0 : i32, i32
  }
  func.func @transform_2(%arg0: i32) -> (i32, i32) {
    %c0_i32 = arith.constant 0 : i32
    %c0_i32_0 = arith.constant 0 : i32
    %c0_i32_1 = arith.constant 0 : i32
    return %c0_i32, %c0_i32_0 : i32, i32
  }
  func.func @transform_3(%arg0: i32) -> (i32, i32) {
    %c0_i32 = arith.constant 0 : i32
    %c0_i32_0 = arith.constant 0 : i32
    %c0_i32_1 = arith.constant 0 : i32
    return %c0_i32, %c0_i32_0 : i32, i32
  }
  func.func @transform_4(%arg0: i32) -> (i32, i32) {
    %c0_i32 = arith.constant 0 : i32
    %c0_i32_0 = arith.constant 0 : i32
    %c0_i32_1 = arith.constant 0 : i32
    return %c0_i32, %c0_i32_0 : i32, i32
  }
  func.func @transform_5(%arg0: i32) -> (i32, i32) {
    %c0_i32 = arith.constant 0 : i32
    %c0_i32_0 = arith.constant 0 : i32
    %c0_i32_1 = arith.constant 0 : i32
    return %c0_i32, %c0_i32_0 : i32, i32
  }
  func.func @transform_6(%arg0: i32) -> (i32, i32) {
    %c0_i32 = arith.constant 0 : i32
    %c0_i32_0 = arith.constant 0 : i32
    %c0_i32_1 = arith.constant 0 : i32
    return %c0_i32, %c0_i32_0 : i32, i32
  }
  func.func @transform_7(%arg0: i32) -> (i32, i32) {
    %c0_i32 = arith.constant 0 : i32
    %c0_i32_0 = arith.constant 0 : i32
    return %arg0, %c0_i32 : i32, i32
  }
}

</mosaic_0001>

<bundles_post_ra>
// kernel: rainbow_dqn_forward.1
= control target key start
LH: loop header
LB: loop body
LE: loop exit
PB: predicated region body
PF: predicated region fallthrough
CT: control target
= control target key end

     0   :  { %s2959_s24 = smov 0   ;;  %s3735_s0 = inlined_call_operand.vmem [shape: bf16[224,128], index: 0, kind: input, shape index: {}]   ;;  %s3736_s1 = inlined_call_operand.vmem [shape: bf16[128,128], index: 1, kind: input, shape index: {}]   ;;  %s3737_s2 = inlined_call_operand.vmem [shape: bf16[128,256], index: 2, kind: input, shape index: {}]   ;;  %s3738_s3 = inlined_call_operand.vmem [shape: bf16[256,256], index: 3, kind: input, shape index: {}]   ;;  %s3739_s4 = inlined_call_operand.vmem [shape: bf16[256,512], index: 4, kind: input, shape index: {}]   ;;  %s3740_s5 = inlined_call_operand.vmem [shape: bf16[512,128], index: 5, kind: input, shape index: {}]   ;;  %s3741_s6 = inlined_call_operand.vmem [shape: f32[8,512], index: 6, kind: input, shape index: {}]   ;;  %s3742_s7 = inlined_call_operand.vmem [shape: f32[224,128], index: 7, kind: output, shape index: {}]  }
   0x1 LB: > { %s2320_s25 = sadd.s32 4294967295, %s2914_s24   ;;  %p2324_p0 = scmp.ge.s32.totalorder %s2914_s24, 1  ;;  %s2914_s24 = sphi %s2959_s24, %s17_s24  }
   0x2   : > { %p238_p1 = scmp.lt.s32.totalorder %s2914_s24, 3 }
   0x4   : > { %p239_p2 = pnand %p2324_p0, %p238_p1 }
   0x5   : > { %v2693_v0 = vld [vmem:[%s3736_s1] sm:$0xff] (!%p239_p2)   ;;  %v2916_v1 = vmov (!%p239_p2), 0.0   ;;  %v2694_v2 = vld [vmem:[%s3736_s1 + $0x8] sm:$0xff] (!%p239_p2)   ;;  %vm2917_vm0 = vmmov (!%p239_p2), 0   ;;  %s270_s30 = smul.u32 (!%p239_p2), 14, %s2320_s25  ;;  %v2695_v3 = vld [vmem:[%s3736_s1 + $0x10] sm:$0xff] (!%p239_p2)  }
   0x6   : > { %242 = sbr.rel (%p239_p2) target bundleno = 1248 (0x4e0), region = 48  ;;  %2622 = vmatprep.subr.bf16.mxu0 (!%p239_p2), %v2916_v1  ;;  %2638 = vmatprep.mubr.msk.bf16.mxu0 (!%p239_p2), %vm2917_vm0, %v2916_v1  ;;  %v2708_v4 = vld [vmem:[%s3737_s2 + $0x4] ss:$8 sps:$4 sm:$0xff] (!%p239_p2)   ;;  %v2710_v5 = vld [vmem:[%s3737_s2] ss:$8 sps:$4 sm:$0xff] (!%p239_p2)   ;;  %v2696_v6 = vld [vmem:[%s3736_s1 + $0x18] sm:$0xff] (!%p239_p2)  }
   0x7   : > { %2623 = vmatpush3.bf16.msra.mxu0 (!%p239_p2), %v2693_v0  ;;  %p271_p3 = scmp.lt.s32.totalorder (!%p239_p2), %s270_s30, 27  ;;  %623 = vmatprep.subr.bf16.mxu1 (!%p239_p2), %v2708_v4  ;;  %v2697_v7 = vld [vmem:[%s3736_s1 + $0x20] sm:$0xff] (!%p239_p2)   ;;  %v2711_v8 = vld [vmem:[%s3737_s2 + $0x14] ss:$8 sps:$4 sm:$0xff] (!%p239_p2)   ;;  %v2713_v9 = vld [vmem:[%s3737_s2 + $0x10] ss:$8 sps:$4 sm:$0xff] (!%p239_p2)  }
   0x8   : > { %2624 = vmatprep.subr.bf16.mxu0 (!%p239_p2), %v2916_v1  ;;  %624 = vmatpush1.bf16.msra.mxu1 (!%p239_p2), %v2710_v5  ;;  %v2698_v10 = vld [vmem:[%s3736_s1 + $0x28] sm:$0xff] (!%p239_p2)   ;;  %v2717_v13 = vld [vmem:[%s3737_s2 + $0x34] ss:$8 sps:$4 sm:$0xff] (!%p239_p2)   ;;  %v2719_v15 = vld [vmem:[%s3737_s2 + $0x30] ss:$8 sps:$4 sm:$0xff] (!%p239_p2)   ;;  %v2918_v32 = vmov (!%p239_p2), 0  }
   0x9   : > { %v2714_v11 = vld [vmem:[%s3737_s2 + $0x24] ss:$8 sps:$4 sm:$0xff] (!%p239_p2)   ;;  %625 = vmatprep.subr.bf16.mxu1 (!%p239_p2), %v2711_v8  ;;  %v2716_v12 = vld [vmem:[%s3737_s2 + $0x20] ss:$8 sps:$4 sm:$0xff] (!%p239_p2)   ;;  %v2699_v14 = vld [vmem:[%s3736_s1 + $0x30] sm:$0xff] (!%p239_p2)   ;;  %655 = vmatprep.mubr.bf16.mxu1 (!%p239_p2), %v2918_v32 }
   0xa   : > { %v2720_v16 = vld [vmem:[%s3737_s2 + $0x44] ss:$8 sps:$4 sm:$0xff] (!%p239_p2)   ;;  %v2700_v17 = vld [vmem:[%s3736_s1 + $0x38] sm:$0xff] (!%p239_p2)   ;;  %v2722_v18 = vld [vmem:[%s3737_s2 + $0x40] ss:$8 sps:$4 sm:$0xff] (!%p239_p2)  }
   0xb   : > { %2625 = vmatpush3.bf16.msra.mxu0 (!%p239_p2), %v2694_v2  ;;  %v2723_v20 = vld [vmem:[%s3737_s2 + $0x54] ss:$8 sps:$4 sm:$0xff] (!%p239_p2)   ;;  %v2725_v21 = vld [vmem:[%s3737_s2 + $0x50] ss:$8 sps:$4 sm:$0xff] (!%p239_p2)   ;;  %v2726_v28 = vld [vmem:[%s3737_s2 + $0x64] ss:$8 sps:$4 sm:$0xff] (!%p239_p2)  }
   0xc   : > { %2626 = vmatprep.subr.bf16.mxu0 (!%p239_p2), %v2916_v1  ;;  %626 = vmatpush1.bf16.msra.mxu1 (!%p239_p2), %v2713_v9  ;;  %v2728_v29 = vld [vmem:[%s3737_s2 + $0x60] ss:$8 sps:$4 sm:$0xff] (!%p239_p2)   ;;  %v2729_v30 = vld [vmem:[%s3737_s2 + $0x74] ss:$8 sps:$4 sm:$0xff] (!%p239_p2)   ;;  %v2731_v31 = vld [vmem:[%s3737_s2 + $0x70] ss:$8 sps:$4 sm:$0xff] (!%p239_p2)  }
   0xd   : > { %s3744_s30 = smov (!%p271_p3, %s270_s30), 27  ;;  %627 = vmatprep.subr.bf16.mxu1 %v2714_v11  ;;  %v2732_v33 = vld [vmem:[%s3738_s3] ss:$8 sps:$4 sm:$0xff]   ;;  %v2734_v34 = vld [vmem:[%s3738_s3 + $0x4] ss:$8 sps:$4 sm:$0xff]  }
   0xe   : > { %s2325_s10 = sshll.u32 %s3744_s30, 2  ;;  %v2737_v35 = vld [vmem:[%s3738_s3 + $0x14] ss:$8 sps:$4 sm:$0xff]   ;;  %v2735_v36 = vld [vmem:[%s3738_s3 + $0x10] ss:$8 sps:$4 sm:$0xff]   ;;  %s2326_s8 = sshll.u32 %s3744_s30, 3 }
   0xf   : > { %s2990_s15 = scalar_lea.vmem %s3735_s0, %s2325_s10  ;;  %2627 = vmatpush3.bf16.msra.mxu0 %v2695_v3  ;;  %v2740_v37 = vld [vmem:[%s3738_s3 + $0x24] ss:$8 sps:$4 sm:$0xff]   ;;  %v2738_v38 = vld [vmem:[%s3738_s3 + $0x20] ss:$8 sps:$4 sm:$0xff]   ;;  %v2743_v39 = vld [vmem:[%s3738_s3 + $0x34] ss:$8 sps:$4 sm:$0xff]   ;;  %s3695_s11 = scalar_lea.vmem %s3742_s7, %s2326_s8 }
  0x10   : > { %2628 = vmatprep.subr.bf16.mxu0 %v2916_v1  ;;  %628 = vmatpush1.bf16.msra.mxu1 %v2716_v12  ;;  %v2701_v19 = vld [vmem:[%s2990_s15] sm:$0xff]   ;;  %v2702_v22 = vld [vmem:[%s2990_s15 + $0x8] sm:$0xff]   ;;  %v2703_v23 = vld [vmem:[%s2990_s15 + $0x10] sm:$0xff]  }
  0x11   : > { %629 = vmatprep.subr.bf16.mxu1 %v2717_v13  ;;  %v2704_v24 = vld [vmem:[%s2990_s15 + $0x18] sm:$0xff]   ;;  %v2705_v25 = vld [vmem:[%s2990_s15 + $0x20] sm:$0xff]   ;;  %v2706_v26 = vld [vmem:[%s2990_s15 + $0x28] sm:$0xff]  }
  0x12   : > { %v2707_v27 = vld [vmem:[%s2990_s15 + $0x30] sm:$0xff]   ;;  %v2746_v41 = vld [vmem:[%s3738_s3 + $0x44] ss:$8 sps:$4 sm:$0xff]   ;;  %v2744_v42 = vld [vmem:[%s3738_s3 + $0x40] ss:$8 sps:$4 sm:$0xff]  }
  0x13   : > { %2629 = vmatpush3.bf16.msra.mxu0 %v2696_v6  ;;  %v2741_v40 = vld [vmem:[%s3738_s3 + $0x30] ss:$8 sps:$4 sm:$0xff]   ;;  %v2749_v43 = vld [vmem:[%s3738_s3 + $0x54] ss:$8 sps:$4 sm:$0xff]   ;;  %v2752_v45 = vld [vmem:[%s3738_s3 + $0x64] ss:$8 sps:$4 sm:$0xff]  }
  0x14   : > { %2630 = vmatprep.subr.bf16.mxu0 %v2916_v1  ;;  %630 = vmatpush1.bf16.msra.mxu1 %v2719_v15  ;;  %v2747_v44 = vld [vmem:[%s3738_s3 + $0x50] ss:$8 sps:$4 sm:$0xff]   ;;  %v2750_v46 = vld [vmem:[%s3738_s3 + $0x60] ss:$8 sps:$4 sm:$0xff]   ;;  %v2755_v47 = vld [vmem:[%s3738_s3 + $0x74] ss:$8 sps:$4 sm:$0xff]  }
  0x15   : > { %631 = vmatprep.subr.bf16.mxu1 %v2720_v16  ;;  %v2753_v48 = vld [vmem:[%s3738_s3 + $0x70] ss:$8 sps:$4 sm:$0xff]   ;;  %v2758_v49 = vld [vmem:[%s3738_s3 + $0x84] ss:$8 sps:$4 sm:$0xff]   ;;  %v2756_v50 = vld [vmem:[%s3738_s3 + $0x80] ss:$8 sps:$4 sm:$0xff]  }
  0x16   : > { %v2761_v51 = vld [vmem:[%s3738_s3 + $0x94] ss:$8 sps:$4 sm:$0xff]   ;;  %v2759_v52 = vld [vmem:[%s3738_s3 + $0x90] ss:$8 sps:$4 sm:$0xff]   ;;  %v2764_v53 = vld [vmem:[%s3738_s3 + $0xa4] ss:$8 sps:$4 sm:$0xff]  }
  0x17   : > { %2631 = vmatpush3.bf16.msra.mxu0 %v2697_v7  ;;  %v2762_v54 = vld [vmem:[%s3738_s3 + $0xa0] ss:$8 sps:$4 sm:$0xff]   ;;  %v2767_v55 = vld [vmem:[%s3738_s3 + $0xb4] ss:$8 sps:$4 sm:$0xff]   ;;  %v2765_v56 = vld [vmem:[%s3738_s3 + $0xb0] ss:$8 sps:$4 sm:$0xff]  }
  0x18   : > { %2632 = vmatprep.subr.bf16.mxu0 %v2916_v1  ;;  %632 = vmatpush1.bf16.msra.mxu1 %v2722_v18  ;;  %v2770_v57 = vld [vmem:[%s3738_s3 + $0xc4] ss:$8 sps:$4 sm:$0xff]   ;;  %v2768_v58 = vld [vmem:[%s3738_s3 + $0xc0] ss:$8 sps:$4 sm:$0xff]   ;;  %v2773_v59 = vld [vmem:[%s3738_s3 + $0xd4] ss:$8 sps:$4 sm:$0xff]  }
  0x19   : > { %633 = vmatprep.subr.bf16.mxu1 %v2723_v20  ;;  %v2771_v60 = vld [vmem:[%s3738_s3 + $0xd0] ss:$8 sps:$4 sm:$0xff]   ;;  %v3164_v61 = vld [vmem:[%s3741_s6] ss:$0 sm:$0xff] }
  0x1b   : > { %2633 = vmatpush3.bf16.msra.mxu0 %v2698_v10 }
  0x1c   : > { %2634 = vmatprep.subr.bf16.mxu0 %v2916_v1  ;;  %634 = vmatpush1.bf16.msra.mxu1 %v2725_v21 }
  0x1d   : > { %635 = vmatprep.subr.bf16.mxu1 %v2726_v28 }
  0x1f   : > { %2635 = vmatpush3.bf16.msra.mxu0 %v2699_v14 }
  0x20   : > { %2636 = vmatprep.subr.bf16.mxu0 %v2916_v1  ;;  %636 = vmatpush1.bf16.msra.mxu1 %v2728_v29 }
  0x21   : > { %637 = vmatprep.subr.bf16.mxu1 %v2729_v30 }
  0x23   : > { %2637 = vmatpush3.bf16.msra.mxu0 %v2700_v17 }
  0x24   : > { %638 = vmatpush1.bf16.msra.mxu1 %v2731_v31  ;;  %973 = vmatprep.subr.bf16.mxu0 %v2734_v34 }
  0x26   : > { %2639 = vmatmul.mubr.bf16.vlgmr.msra.gmra.mrb[0].mxu0 %v2701_v19 }
  0x27   : > { %2642 = vmatprep.mubr.msk.bf16.mxu0 %vm2917_vm0, %v2916_v1  ;;  %974 = vmatpush1.bf16.msra.mxu0 %v2732_v33 }
  0x28   : > { %975 = vmatprep.subr.bf16.mxu0 %v2737_v35 }
  0x2b   : > { %976 = vmatpush1.bf16.msra.mxu0 %v2735_v36 }
  0x2c   : > { %977 = vmatprep.subr.bf16.mxu0 %v2740_v37 }
  0x2e   : > { %2643 = vmatmul.mubr.bf16.gmra.mrb[4].mxu0 %v2702_v22 }
  0x2f   : > { %2646 = vmatprep.mubr.msk.bf16.mxu0 %vm2917_vm0, %v2916_v1  ;;  %978 = vmatpush1.bf16.msra.mxu0 %v2738_v38 }
  0x30   : > { %979 = vmatprep.subr.bf16.mxu0 %v2743_v39 }
  0x33   : > { %980 = vmatpush1.bf16.msra.mxu0 %v2741_v40 }
  0x34   : > { %981 = vmatprep.subr.bf16.mxu0 %v2746_v41 }
  0x36   : > { %2647 = vmatmul.mubr.bf16.gmra.mrb[8].mxu0 %v2703_v23 }
  0x37   : > { %2650 = vmatprep.mubr.msk.bf16.mxu0 %vm2917_vm0, %v2916_v1  ;;  %982 = vmatpush1.bf16.msra.mxu0 %v2744_v42 }
  0x38   : > { %983 = vmatprep.subr.bf16.mxu0 %v2749_v43 }
  0x3b   : > { %984 = vmatpush1.bf16.msra.mxu0 %v2747_v44 }
  0x3c   : > { %985 = vmatprep.subr.bf16.mxu0 %v2752_v45 }
  0x3e   : > { %2651 = vmatmul.mubr.bf16.gmra.mrb[12].mxu0 %v2704_v24 }
  0x3f   : > { %2654 = vmatprep.mubr.msk.bf16.mxu0 %vm2917_vm0, %v2916_v1  ;;  %986 = vmatpush1.bf16.msra.mxu0 %v2750_v46 }
  0x40   : > { %987 = vmatprep.subr.bf16.mxu0 %v2755_v47 }
  0x43   : > { %988 = vmatpush1.bf16.msra.mxu0 %v2753_v48 }
  0x44   : > { %989 = vmatprep.subr.bf16.mxu0 %v2758_v49 }
  0x46   : > { %2655 = vmatmul.mubr.bf16.gmra.mrb[16].mxu0 %v2705_v25 }
  0x47   : > { %2658 = vmatprep.mubr.msk.bf16.mxu0 %vm2917_vm0, %v2916_v1  ;;  %990 = vmatpush1.bf16.msra.mxu0 %v2756_v50 }
  0x48   : > { %991 = vmatprep.subr.bf16.mxu0 %v2761_v51 }
  0x4b   : > { %992 = vmatpush1.bf16.msra.mxu0 %v2759_v52 }
  0x4c   : > { %993 = vmatprep.subr.bf16.mxu0 %v2764_v53 }
  0x4e   : > { %2659 = vmatmul.mubr.bf16.gmra.mrb[20].mxu0 %v2706_v26 }
  0x4f   : > { %2662 = vmatprep.mubr.msk.bf16.mxu0 %vm2917_vm0, %v2916_v1  ;;  %994 = vmatpush1.bf16.msra.mxu0 %v2762_v54 }
  0x50   : > { %995 = vmatprep.subr.bf16.mxu0 %v2767_v55 }
  0x53   : > { %996 = vmatpush1.bf16.msra.mxu0 %v2765_v56 }
  0x54   : > { %997 = vmatprep.subr.bf16.mxu0 %v2770_v57 }
  0x56   : > { %2663 = vmatmul.mubr.bf16.gmra.mrb[24].mxu0 %v2707_v27 }
  0x57   : > { %998 = vmatpush1.bf16.msra.mxu0 %v2768_v58 }
  0x58   : > { %999 = vmatprep.subr.bf16.mxu0 %v2773_v59 }
  0x5b   : > { %1000 = vmatpush1.bf16.msra.mxu0 %v2771_v60 }
  0xf9   : > { %v438_v62 = vpop.f32.mrb[0].mxu0 }
  0xfa   : > { %v439_v63 = vadd.f32 %v438_v62, %v3164_v61  ;;  %v2640_v0 = vpop.f32.mrb[1].mxu0 }
  0xfb   : > { %v441_v1 = vpop.f32.mrb[2].mxu0  ;;  %v2774_v0 = vld [vmem:[%s3738_s3 + $0xe0] ss:$8 sps:$4 sm:$0xff]  }
  0xfc   : > { %v442_v2 = vadd.f32 %v441_v1, %v3164_v61  ;;  %v2641_v3 = vpop.f32.mrb[3].mxu0  ;;  %v493_v4 = vmax.f32 %v439_v63, 0.0  ;;  %v2776_v63 = vld [vmem:[%s3738_s3 + $0xe4] ss:$8 sps:$4 sm:$0xff]   ;;  %v2780_v1 = vld [vmem:[%s3739_s4] ss:$16 sps:$4 sm:$0xff]  }
  0xfd   : > { %1001 = vmatprep.subr.bf16.mxu0 %v2776_v63  ;;  %v2785_v3 = vld [vmem:[%s3739_s4 + $0xc] ss:$16 sps:$4 sm:$0xff]   ;;  %v2789_v63 = vld [vmem:[%s3739_s4 + $0x28] ss:$16 sps:$4 sm:$0xff]  }
  0xfe   : > { %v494_v5 = vmax.f32 %v442_v2, 0.0  ;;  %1002 = vmatpush1.bf16.msra.mxu0 %v2774_v0  ;;  %v2782_v2 = vld [vmem:[%s3739_s4 + $0x4] ss:$16 sps:$4 sm:$0xff]  }
  0xff   : > { %1525 = vmatprep.subr.bf16.mxu1 %v2782_v2 }
 0x100   : > { %v507_v6 = vpack.c.bf16 %v494_v5, %v493_v4  ;;  %v2788_v4 = vld [vmem:[%s3739_s4 + $0x24] ss:$16 sps:$4 sm:$0xff]   ;;  %v2786_v5 = vld [vmem:[%s3739_s4 + $0x20] ss:$16 sps:$4 sm:$0xff]  }
 0x101   : > { %v446_v7 = vpop.f32.mrb[4].mxu0 }
 0x102   : > { %v447_v8 = vadd.f32 %v446_v7, %v3164_v61  ;;  %v2644_v9 = vpop.f32.mrb[5].mxu0  ;;  %656 = vmatmul.mubr.bf16.vlgmr.msra.gmra.mrb[0].mxu1 %v507_v6  ;;  %v2794_v6 = vld [vmem:[%s3739_s4 + $0x44] ss:$16 sps:$4 sm:$0xff]   ;;  %v2792_v7 = vld [vmem:[%s3739_s4 + $0x40] ss:$16 sps:$4 sm:$0xff]  }
 0x103   : > { %v449_v10 = vpop.f32.mrb[6].mxu0  ;;  %665 = vmatprep.mubr.bf16.mxu1 %v2918_v32  ;;  %1526 = vmatpush1.bf16.msra.mxu1 %v2780_v1  ;;  %v2798_v9 = vld [vmem:[%s3739_s4 + $0x60] ss:$16 sps:$4 sm:$0xff]  }
 0x104   : > { %v450_v11 = vadd.f32 %v449_v10, %v3164_v61  ;;  %v2645_v12 = vpop.f32.mrb[7].mxu0  ;;  %v495_v13 = vmax.f32 %v447_v8, 0.0  ;;  %1527 = vmatprep.subr.bf16.mxu1 %v2788_v4  ;;  %v2800_v8 = vld [vmem:[%s3739_s4 + $0x64] ss:$16 sps:$4 sm:$0xff]  }
 0x105   : > { %v2806_v10 = vld [vmem:[%s3739_s4 + $0x84] ss:$16 sps:$4 sm:$0xff]  }
 0x106   : > { %v496_v14 = vmax.f32 %v450_v11, 0.0  ;;  %v2804_v11 = vld [vmem:[%s3739_s4 + $0x80] ss:$16 sps:$4 sm:$0xff]   ;;  %v2812_v12 = vld [vmem:[%s3739_s4 + $0xa4] ss:$16 sps:$4 sm:$0xff]  }
 0x107   : > { %1528 = vmatpush1.bf16.msra.mxu1 %v2786_v5 }
 0x108   : > { %v508_v15 = vpack.c.bf16 %v496_v14, %v495_v13  ;;  %1529 = vmatprep.subr.bf16.mxu1 %v2794_v6  ;;  %v2810_v13 = vld [vmem:[%s3739_s4 + $0xa0] ss:$16 sps:$4 sm:$0xff]   ;;  %v2818_v14 = vld [vmem:[%s3739_s4 + $0xc4] ss:$16 sps:$4 sm:$0xff]   ;;  %v2795_v6 = vld [vmem:[%s3739_s4 + $0x48] ss:$16 sps:$4 sm:$0xff]  }
 0x109   : > { %v454_v16 = vpop.f32.mrb[8].mxu0 }
 0x10a   : > { %v455_v17 = vadd.f32 %v454_v16, %v3164_v61  ;;  %v2648_v18 = vpop.f32.mrb[9].mxu0  ;;  %666 = vmatmul.mubr.bf16.gmra.mrb[4].mxu1 %v508_v15  ;;  %v2816_v15 = vld [vmem:[%s3739_s4 + $0xc0] ss:$16 sps:$4 sm:$0xff]   ;;  %v2824_v16 = vld [vmem:[%s3739_s4 + $0xe4] ss:$16 sps:$4 sm:$0xff]  }
 0x10b   : > { %v457_v19 = vpop.f32.mrb[10].mxu0  ;;  %675 = vmatprep.mubr.bf16.mxu1 %v2918_v32  ;;  %1530 = vmatpush1.bf16.msra.mxu1 %v2792_v7  ;;  %v2830_v18 = vld [vmem:[%s3739_s4 + $0x104] ss:$16 sps:$4 sm:$0xff]  }
 0x10c   : > { %v458_v20 = vadd.f32 %v457_v19, %v3164_v61  ;;  %v2649_v21 = vpop.f32.mrb[11].mxu0  ;;  %v497_v22 = vmax.f32 %v455_v17, 0.0  ;;  %1531 = vmatprep.subr.bf16.mxu1 %v2800_v8  ;;  %v2822_v17 = vld [vmem:[%s3739_s4 + $0xe0] ss:$16 sps:$4 sm:$0xff]  }
 0x10d   : > { %v2828_v19 = vld [vmem:[%s3739_s4 + $0x100] ss:$16 sps:$4 sm:$0xff]  }
 0x10e   : > { %v498_v23 = vmax.f32 %v458_v20, 0.0  ;;  %v2836_v20 = vld [vmem:[%s3739_s4 + $0x124] ss:$16 sps:$4 sm:$0xff]   ;;  %v2834_v21 = vld [vmem:[%s3739_s4 + $0x120] ss:$16 sps:$4 sm:$0xff]  }
 0x10f   : > { %1532 = vmatpush1.bf16.msra.mxu1 %v2798_v9  ;;  %v2803_v9 = vld [vmem:[%s3739_s4 + $0x6c] ss:$16 sps:$4 sm:$0xff]  }
 0x110   : > { %v509_v24 = vpack.c.bf16 %v498_v23, %v497_v22  ;;  %1533 = vmatprep.subr.bf16.mxu1 %v2806_v10  ;;  %v2842_v22 = vld [vmem:[%s3739_s4 + $0x144] ss:$16 sps:$4 sm:$0xff]   ;;  %v2840_v23 = vld [vmem:[%s3739_s4 + $0x140] ss:$16 sps:$4 sm:$0xff]  }
 0x111   : > { %v462_v25 = vpop.f32.mrb[12].mxu0 }
 0x112   : > { %v463_v26 = vadd.f32 %v462_v25, %v3164_v61  ;;  %v2652_v27 = vpop.f32.mrb[13].mxu0  ;;  %676 = vmatmul.mubr.bf16.gmra.mrb[8].mxu1 %v509_v24  ;;  %v2848_v24 = vld [vmem:[%s3739_s4 + $0x164] ss:$16 sps:$4 sm:$0xff]   ;;  %v2846_v25 = vld [vmem:[%s3739_s4 + $0x160] ss:$16 sps:$4 sm:$0xff]  }
 0x113   : > { %v465_v28 = vpop.f32.mrb[14].mxu0  ;;  %685 = vmatprep.mubr.bf16.mxu1 %v2918_v32  ;;  %1534 = vmatpush1.bf16.msra.mxu1 %v2804_v11  ;;  %v2852_v27 = vld [vmem:[%s3739_s4 + $0x180] ss:$16 sps:$4 sm:$0xff]  }
 0x114   : > { %v466_v29 = vadd.f32 %v465_v28, %v3164_v61  ;;  %v2653_v30 = vpop.f32.mrb[15].mxu0  ;;  %v499_v31 = vmax.f32 %v463_v26, 0.0  ;;  %1535 = vmatprep.subr.bf16.mxu1 %v2812_v12  ;;  %v2854_v26 = vld [vmem:[%s3739_s4 + $0x184] ss:$16 sps:$4 sm:$0xff]  }
 0x115   : > { %v2860_v28 = vld [vmem:[%s3739_s4 + $0x1a4] ss:$16 sps:$4 sm:$0xff]   ;;  %v533_v30 = vlaneseq }
 0x116   : > { %v500_v33 = vmax.f32 %v466_v29, 0.0  ;;  %v2858_v29 = vld [vmem:[%s3739_s4 + $0x1a0] ss:$16 sps:$4 sm:$0xff]  }
 0x117   : > { %1536 = vmatpush1.bf16.msra.mxu1 %v2810_v13 }
 0x118   : > { %v510_v34 = vpack.c.bf16 %v500_v33, %v499_v31  ;;  %1537 = vmatprep.subr.bf16.mxu1 %v2818_v14  ;;  %v3285_v31 = vshrl.u32 %v533_v30, 7 }
 0x119   : > { %v470_v35 = vpop.f32.mrb[16].mxu0 }
 0x11a   : > { %v471_v36 = vadd.f32 %v470_v35, %v3164_v61  ;;  %v2656_v37 = vpop.f32.mrb[17].mxu0  ;;  %686 = vmatmul.mubr.bf16.gmra.mrb[12].mxu1 %v510_v34  ;;  %v3288_v33 = vsub.s32 0, %v3285_v31  ;;  %v2342_v34 = vld [vmem:[%s3741_s6 + $0x1] ss:$8 sm:$0x3]  ;;  %v3294_v35 = vsub.s32 1, %v3285_v31 }
 0x11b   : > { %v473_v38 = vpop.f32.mrb[18].mxu0  ;;  %695 = vmatprep.mubr.bf16.mxu1 %v2918_v32  ;;  %1538 = vmatpush1.bf16.msra.mxu1 %v2816_v15  ;;  %v2801_v15 = vld [vmem:[%s3739_s4 + $0x68] ss:$16 sps:$4 sm:$0xff]  }
 0x11c   : > { %v474_v39 = vadd.f32 %v473_v38, %v3164_v61  ;;  %v2657_v40 = vpop.f32.mrb[19].mxu0  ;;  %v501_v41 = vmax.f32 %v471_v36, 0.0  ;;  %1539 = vmatprep.subr.bf16.mxu1 %v2824_v16  ;;  %v3297_v36 = vrot.slane %v2342_v34, %v3288_v33  ;;  %v3300_v37 = vrot.slane %v2342_v34, %v3294_v35 }
 0x11e   : > { %v502_v42 = vmax.f32 %v474_v39, 0.0 }
 0x11f   : > { %1540 = vmatpush1.bf16.msra.mxu1 %v2822_v17 }
 0x120   : > { %v511_v43 = vpack.c.bf16 %v502_v42, %v501_v41  ;;  %1541 = vmatprep.subr.bf16.mxu1 %v2830_v18  ;;  %v2809_v18 = vld [vmem:[%s3739_s4 + $0x8c] ss:$16 sps:$4 sm:$0xff]  }
 0x121   : > { %v478_v44 = vpop.f32.mrb[20].mxu0 }
 0x122   : > { %v479_v45 = vadd.f32 %v478_v44, %v3164_v61  ;;  %v2660_v46 = vpop.f32.mrb[21].mxu0  ;;  %696 = vmatmul.mubr.bf16.gmra.mrb[16].mxu1 %v511_v43 }
 0x123   : > { %v481_v47 = vpop.f32.mrb[22].mxu0  ;;  %705 = vmatprep.mubr.bf16.mxu1 %v2918_v32  ;;  %1542 = vmatpush1.bf16.msra.mxu1 %v2828_v19 }
 0x124   : > { %v482_v48 = vadd.f32 %v481_v47, %v3164_v61  ;;  %v2661_v49 = vpop.f32.mrb[23].mxu0  ;;  %v503_v50 = vmax.f32 %v479_v45, 0.0  ;;  %1543 = vmatprep.subr.bf16.mxu1 %v2836_v20 }
 0x126   : > { %v504_v51 = vmax.f32 %v482_v48, 0.0 }
 0x127   : > { %1544 = vmatpush1.bf16.msra.mxu1 %v2834_v21 }
 0x128   : > { %v512_v52 = vpack.c.bf16 %v504_v51, %v503_v50  ;;  %1545 = vmatprep.subr.bf16.mxu1 %v2842_v22 }
 0x129   : > { %v486_v53 = vpop.f32.mrb[24].mxu0 }
 0x12a   : > { %v487_v54 = vadd.f32 %v486_v53, %v3164_v61  ;;  %v2664_v55 = vpop.f32.mrb[25].mxu0  ;;  %706 = vmatmul.mubr.bf16.gmra.mrb[20].mxu1 %v512_v52  ;;  %v2783_v53 = vld [vmem:[%s3739_s4 + $0x8] ss:$16 sps:$4 sm:$0xff]  }
 0x12b   : > { %v489_v56 = vpop.f32.mrb[26].mxu0  ;;  %715 = vmatprep.mubr.bf16.mxu1 %v2918_v32  ;;  %v2779_v32 = vld [vmem:[%s3738_s3 + $0xf4] ss:$8 sps:$4 sm:$0xff]   ;;  %1546 = vmatpush1.bf16.msra.mxu1 %v2840_v23 }
 0x12c   : > { %v490_v57 = vadd.f32 %v489_v56, %v3164_v61  ;;  %v2665_v58 = vpop.f32.mrb[27].mxu0  ;;  %v505_v59 = vmax.f32 %v487_v54, 0.0  ;;  %v2777_v61 = vld [vmem:[%s3738_s3 + $0xf0] ss:$8 sps:$4 sm:$0xff]   ;;  %1003 = vmatprep.subr.bf16.mxu0 %v2779_v32  ;;  %1547 = vmatprep.subr.bf16.mxu1 %v2848_v24  ;;  %v2791_v56 = vld [vmem:[%s3739_s4 + $0x2c] ss:$16 sps:$4 sm:$0xff]  }
 0x12d   : > { %1004 = vmatpush1.bf16.msra.mxu0 %v2777_v61  ;;  %v2797_v61 = vld [vmem:[%s3739_s4 + $0x4c] ss:$16 sps:$4 sm:$0xff]   ;;  %v2807_v24 = vld [vmem:[%s3739_s4 + $0x88] ss:$16 sps:$4 sm:$0xff]  }
 0x12e   : > { %v506_v60 = vmax.f32 %v490_v57, 0.0  ;;  %1628 = vmatprep.subr.bf16.mxu0 %v2785_v3 }
 0x12f   : > { %1548 = vmatpush1.bf16.msra.mxu1 %v2846_v25 }
 0x130   : > { %v513_v62 = vpack.c.bf16 %v506_v60, %v505_v59  ;;  %1549 = vmatprep.subr.bf16.mxu1 %v2854_v26 }
 0x132   : > { %716 = vmatmul.mubr.bf16.gmra.mrb[24].mxu1 %v513_v62 }
 0x133   : > { %1550 = vmatpush1.bf16.msra.mxu1 %v2852_v27  ;;  %v2815_v27 = vld [vmem:[%s3739_s4 + $0xac] ss:$16 sps:$4 sm:$0xff]  }
 0x134   : > { %1551 = vmatprep.subr.bf16.mxu1 %v2860_v28 }
 0x137   : > { %1552 = vmatpush1.bf16.msra.mxu1 %v2858_v29 }
 0x1d5   : > { %v657_v38 = vpop.f32.mrb[0].mxu1 }
 0x1d6   : > { %v658_v39 = vadd.f32 %v657_v38, %v3297_v36  ;;  %v659_v40 = vpop.f32.mrb[1].mxu1 }
 0x1d7   : > { %v660_v41 = vadd.f32 %v659_v40, %v3300_v37  ;;  %v661_v42 = vpop.f32.mrb[2].mxu1 }
 0x1d8   : > { %v662_v43 = vadd.f32 %v661_v42, %v3297_v36  ;;  %v663_v44 = vpop.f32.mrb[3].mxu1  ;;  %v726_v46 = vmax.f32 %v658_v39, 0.0  ;;  %v2813_v39 = vld [vmem:[%s3739_s4 + $0xa8] ss:$16 sps:$4 sm:$0xff]   ;;  %v2821_v42 = vld [vmem:[%s3739_s4 + $0xcc] ss:$16 sps:$4 sm:$0xff]  }
 0x1d9   : > { %v664_v45 = vadd.f32 %v663_v44, %v3300_v37  ;;  %v727_v48 = vmax.f32 %v660_v41, 0.0 }
 0x1da   : > { %v728_v47 = vmax.f32 %v662_v43, 0.0 }
 0x1db   : > { %v729_v49 = vmax.f32 %v664_v45, 0.0 }
 0x1dc   : > { %v754_v50 = vpack.c.bf16 %v728_v47, %v726_v46 }
 0x1dd   : > { %v755_v51 = vpack.c.bf16 %v729_v49, %v727_v48  ;;  %v667_v52 = vpop.f32.mrb[4].mxu1  ;;  %v2819_v48 = vld [vmem:[%s3739_s4 + $0xc8] ss:$16 sps:$4 sm:$0xff]  }
 0x1de   : > { %v668_v54 = vadd.f32 %v667_v52, %v3297_v36  ;;  %v669_v55 = vpop.f32.mrb[5].mxu1 }
 0x1df   : > { %v670_v57 = vadd.f32 %v669_v55, %v3300_v37  ;;  %v671_v58 = vpop.f32.mrb[6].mxu1  ;;  %1005 = vmatprep.mubr.bf16.mxu0 %v755_v51  ;;  %v2827_v51 = vld [vmem:[%s3739_s4 + $0xec] ss:$16 sps:$4 sm:$0xff]  }
 0x1e0   : > { %v672_v59 = vadd.f32 %v671_v58, %v3297_v36  ;;  %v673_v60 = vpop.f32.mrb[7].mxu1  ;;  %1006 = vmatmul.mubr.bf16.vlgmr.msra.gmra.mrb[28].mxu0 %v754_v50  ;;  %v730_v0 = vmax.f32 %v668_v54, 0.0 }
 0x1e1   : > { %v674_v62 = vadd.f32 %v673_v60, %v3300_v37  ;;  %1629 = vmatpush1.bf16.msra.mxu0 %v2783_v53  ;;  %v731_v1 = vmax.f32 %v670_v57, 0.0  ;;  %v2825_v57 = vld [vmem:[%s3739_s4 + $0xe8] ss:$16 sps:$4 sm:$0xff]   ;;  %v2833_v60 = vld [vmem:[%s3739_s4 + $0x10c] ss:$16 sps:$4 sm:$0xff]  }
 0x1e2   : > { %v732_v32 = vmax.f32 %v672_v59, 0.0  ;;  %1630 = vmatprep.subr.bf16.mxu0 %v2791_v56 }
 0x1e3   : > { %v733_v2 = vmax.f32 %v674_v62, 0.0 }
 0x1e4   : > { %v756_v3 = vpack.c.bf16 %v732_v32, %v730_v0 }
 0x1e5   : > { %v757_v4 = vpack.c.bf16 %v733_v2, %v731_v1  ;;  %v677_v5 = vpop.f32.mrb[8].mxu1  ;;  %1631 = vmatpush1.bf16.msra.mxu0 %v2789_v63  ;;  %v2831_v1 = vld [vmem:[%s3739_s4 + $0x108] ss:$16 sps:$4 sm:$0xff]  }
 0x1e6   : > { %v678_v7 = vadd.f32 %v677_v5, %v3297_v36  ;;  %v679_v8 = vpop.f32.mrb[9].mxu1  ;;  %1632 = vmatprep.subr.bf16.mxu0 %v2797_v61 }
 0x1e7   : > { %v680_v10 = vadd.f32 %v679_v8, %v3300_v37  ;;  %v681_v11 = vpop.f32.mrb[10].mxu1  ;;  %1015 = vmatprep.mubr.bf16.mxu0 %v757_v4  ;;  %v2839_v4 = vld [vmem:[%s3739_s4 + $0x12c] ss:$16 sps:$4 sm:$0xff]  }
 0x1e8   : > { %v682_v12 = vadd.f32 %v681_v11, %v3297_v36  ;;  %v683_v13 = vpop.f32.mrb[11].mxu1  ;;  %1016 = vmatmul.mubr.bf16.gmra.mrb[32].mxu0 %v756_v3  ;;  %v734_v16 = vmax.f32 %v678_v7, 0.0 }
 0x1e9   : > { %v684_v14 = vadd.f32 %v683_v13, %v3300_v37  ;;  %1633 = vmatpush1.bf16.msra.mxu0 %v2795_v6  ;;  %v735_v19 = vmax.f32 %v680_v10, 0.0  ;;  %v2837_v10 = vld [vmem:[%s3739_s4 + $0x128] ss:$16 sps:$4 sm:$0xff]   ;;  %v2845_v13 = vld [vmem:[%s3739_s4 + $0x14c] ss:$16 sps:$4 sm:$0xff]  }
 0x1ea   : > { %v736_v17 = vmax.f32 %v682_v12, 0.0  ;;  %1634 = vmatprep.subr.bf16.mxu0 %v2803_v9 }
 0x1eb   : > { %v737_v20 = vmax.f32 %v684_v14, 0.0 }
 0x1ec   : > { %v758_v21 = vpack.c.bf16 %v736_v17, %v734_v16 }
 0x1ed   : > { %v759_v22 = vpack.c.bf16 %v737_v20, %v735_v19  ;;  %v687_v23 = vpop.f32.mrb[12].mxu1  ;;  %1635 = vmatpush1.bf16.msra.mxu0 %v2801_v15  ;;  %v2843_v19 = vld [vmem:[%s3739_s4 + $0x148] ss:$16 sps:$4 sm:$0xff]  }
 0x1ee   : > { %v688_v25 = vadd.f32 %v687_v23, %v3297_v36  ;;  %v689_v26 = vpop.f32.mrb[13].mxu1  ;;  %1636 = vmatprep.subr.bf16.mxu0 %v2809_v18 }
 0x1ef   : > { %v690_v28 = vadd.f32 %v689_v26, %v3300_v37  ;;  %v691_v29 = vpop.f32.mrb[14].mxu1  ;;  %1025 = vmatprep.mubr.bf16.mxu0 %v759_v22  ;;  %v2851_v22 = vld [vmem:[%s3739_s4 + $0x16c] ss:$16 sps:$4 sm:$0xff]  }
 0x1f0   : > { %v692_v30 = vadd.f32 %v691_v29, %v3297_v36  ;;  %v693_v34 = vpop.f32.mrb[15].mxu1  ;;  %1026 = vmatmul.mubr.bf16.gmra.mrb[36].mxu0 %v758_v21  ;;  %v738_v40 = vmax.f32 %v688_v25, 0.0 }
 0x1f1   : > { %v694_v38 = vadd.f32 %v693_v34, %v3300_v37  ;;  %1637 = vmatpush1.bf16.msra.mxu0 %v2807_v24  ;;  %v739_v43 = vmax.f32 %v690_v28, 0.0  ;;  %v2849_v28 = vld [vmem:[%s3739_s4 + $0x168] ss:$16 sps:$4 sm:$0xff]   ;;  %v2857_v34 = vld [vmem:[%s3739_s4 + $0x18c] ss:$16 sps:$4 sm:$0xff]  }
 0x1f2   : > { %v740_v41 = vmax.f32 %v692_v30, 0.0  ;;  %1638 = vmatprep.subr.bf16.mxu0 %v2815_v27 }
 0x1f3   : > { %v741_v44 = vmax.f32 %v694_v38, 0.0 }
 0x1f4   : > { %v760_v45 = vpack.c.bf16 %v740_v41, %v738_v40  ;;  %v2863_v41 = vld [vmem:[%s3739_s4 + $0x1ac] ss:$16 sps:$4 sm:$0xff]  }
 0x1f5   : > { %v761_v46 = vpack.c.bf16 %v741_v44, %v739_v43  ;;  %v697_v47 = vpop.f32.mrb[16].mxu1  ;;  %1639 = vmatpush1.bf16.msra.mxu0 %v2813_v39  ;;  %v2866_v43 = vld [vmem:[%s3739_s4 + $0x1c4] ss:$16 sps:$4 sm:$0xff]   ;;  %v2869_v44 = vld [vmem:[%s3739_s4 + $0x1cc] ss:$16 sps:$4 sm:$0xff]  }
 0x1f6   : > { %v698_v49 = vadd.f32 %v697_v47, %v3297_v36  ;;  %v699_v50 = vpop.f32.mrb[17].mxu1  ;;  %1640 = vmatprep.subr.bf16.mxu0 %v2821_v42  ;;  %v2861_v42 = vld [vmem:[%s3739_s4 + $0x1a8] ss:$16 sps:$4 sm:$0xff]   ;;  %1553 = vmatprep.subr.bf16.mxu1 %v2866_v43  ;;  %v2872_v47 = vld [vmem:[%s3739_s4 + $0x1e4] ss:$16 sps:$4 sm:$0xff]  }
 0x1f7   : > { %v700_v52 = vadd.f32 %v699_v50, %v3300_v37  ;;  %v701_v53 = vpop.f32.mrb[18].mxu1  ;;  %1035 = vmatprep.mubr.bf16.mxu0 %v761_v46  ;;  %v2867_v46 = vld [vmem:[%s3739_s4 + $0x1c8] ss:$16 sps:$4 sm:$0xff]  }
 0x1f8   : > { %v702_v54 = vadd.f32 %v701_v53, %v3297_v36  ;;  %v703_v55 = vpop.f32.mrb[19].mxu1  ;;  %1036 = vmatmul.mubr.bf16.gmra.mrb[40].mxu0 %v760_v45  ;;  %v742_v58 = vmax.f32 %v698_v49, 0.0  ;;  %v2864_v45 = vld [vmem:[%s3739_s4 + $0x1c0] ss:$16 sps:$4 sm:$0xff]   ;;  %v2873_v50 = vld [vmem:[%s3739_s4 + $0x1e8] ss:$16 sps:$4 sm:$0xff]  }
 0x1f9   : > { %v704_v56 = vadd.f32 %v703_v55, %v3300_v37  ;;  %1641 = vmatpush1.bf16.msra.mxu0 %v2819_v48  ;;  %v743_v62 = vmax.f32 %v700_v52, 0.0  ;;  %1554 = vmatpush1.bf16.msra.mxu1 %v2864_v45  ;;  %v2875_v48 = vld [vmem:[%s3739_s4 + $0x1ec] ss:$16 sps:$4 sm:$0xff]   ;;  %v2870_v49 = vld [vmem:[%s3739_s4 + $0x1e0] ss:$16 sps:$4 sm:$0xff]  }
 0x1fa   : > { %v744_v59 = vmax.f32 %v702_v54, 0.0  ;;  %1642 = vmatprep.subr.bf16.mxu0 %v2827_v51  ;;  %1555 = vmatprep.subr.bf16.mxu1 %v2872_v47  ;;  %v2876_v51 = vld [vmem:[%s3740_s5 + $0x40] sm:$0xff]  }
 0x1fb   : > { %v745_v63 = vmax.f32 %v704_v56, 0.0  ;;  %v2359_v52 = vld [vmem:[%s3741_s6 + $0x2] ss:$8 sm:$0x3] }
 0x1fc   : > { %v762_v0 = vpack.c.bf16 %v744_v59, %v742_v58  ;;  %v3442_v53 = vrot.slane %v2359_v52, %v3288_v33  ;;  %v3445_v54 = vrot.slane %v2359_v52, %v3294_v35  ;;  %v2885_v45 = vld [vmem:[%s3740_s5 + $0x20] sm:$0xff]  }
 0x1fd   : > { %v763_v32 = vpack.c.bf16 %v745_v63, %v743_v62  ;;  %v707_v61 = vpop.f32.mrb[20].mxu1  ;;  %1643 = vmatpush1.bf16.msra.mxu0 %v2825_v57  ;;  %1556 = vmatpush1.bf16.msra.mxu1 %v2870_v49 }
 0x1fe   : > { %v708_v2 = vadd.f32 %v707_v61, %v3297_v36  ;;  %v709_v3 = vpop.f32.mrb[21].mxu1  ;;  %1644 = vmatprep.subr.bf16.mxu0 %v2833_v60  ;;  %2666 = vmatprep.subr.bf16.mxu1 %v2876_v51 }
 0x1ff   : > { %v710_v5 = vadd.f32 %v709_v3, %v3300_v37  ;;  %v711_v6 = vpop.f32.mrb[22].mxu1  ;;  %1045 = vmatprep.mubr.bf16.mxu0 %v763_v32 }
 0x200   : > { %v712_v7 = vadd.f32 %v711_v6, %v3297_v36  ;;  %v713_v8 = vpop.f32.mrb[23].mxu1  ;;  %1046 = vmatmul.mubr.bf16.gmra.mrb[44].mxu0 %v762_v0  ;;  %v746_v11 = vmax.f32 %v708_v2, 0.0 }
 0x201   : > { %v714_v9 = vadd.f32 %v713_v8, %v3300_v37  ;;  %1645 = vmatpush1.bf16.msra.mxu0 %v2831_v1  ;;  %v747_v14 = vmax.f32 %v710_v5, 0.0  ;;  %v2877_v5 = vld [vmem:[%s3740_s5] sm:$0xff]   ;;  %v2878_v8 = vld [vmem:[%s3740_s5 + $0x48] sm:$0xff]  }
 0x202   : > { %v748_v12 = vmax.f32 %v712_v7, 0.0  ;;  %1646 = vmatprep.subr.bf16.mxu0 %v2839_v4 }
 0x203   : > { %v749_v15 = vmax.f32 %v714_v9, 0.0 }
 0x204   : > { %v764_v16 = vpack.c.bf16 %v748_v12, %v746_v11 }
 0x205   : > { %v765_v17 = vpack.c.bf16 %v749_v15, %v747_v14  ;;  %v717_v18 = vpop.f32.mrb[24].mxu1  ;;  %1647 = vmatpush1.bf16.msra.mxu0 %v2837_v10  ;;  %v2879_v14 = vld [vmem:[%s3740_s5 + $0x8] sm:$0xff]  }
 0x206   : > { %v718_v20 = vadd.f32 %v717_v18, %v3297_v36  ;;  %v719_v21 = vpop.f32.mrb[25].mxu1  ;;  %1648 = vmatprep.subr.bf16.mxu0 %v2845_v13 }
 0x207   : > { %v720_v23 = vadd.f32 %v719_v21, %v3300_v37  ;;  %v721_v24 = vpop.f32.mrb[26].mxu1  ;;  %1055 = vmatprep.mubr.bf16.mxu0 %v765_v17  ;;  %v2880_v17 = vld [vmem:[%s3740_s5 + $0x50] sm:$0xff]  }
 0x208   : > { %v722_v25 = vadd.f32 %v721_v24, %v3297_v36  ;;  %v723_v26 = vpop.f32.mrb[27].mxu1  ;;  %1056 = vmatmul.mubr.bf16.gmra.mrb[48].mxu0 %v764_v16  ;;  %v750_v29 = vmax.f32 %v718_v20, 0.0 }
 0x209   : > { %v724_v27 = vadd.f32 %v723_v26, %v3300_v37  ;;  %1649 = vmatpush1.bf16.msra.mxu0 %v2843_v19  ;;  %v751_v38 = vmax.f32 %v720_v23, 0.0  ;;  %v2855_v37 = vld [vmem:[%s3739_s4 + $0x188] ss:$16 sps:$4 sm:$0xff]   ;;  %v2881_v23 = vld [vmem:[%s3740_s5 + $0x10] sm:$0xff]  }
 0x20a   : > { %v752_v30 = vmax.f32 %v722_v25, 0.0  ;;  %1650 = vmatprep.subr.bf16.mxu0 %v2851_v22  ;;  %v2882_v26 = vld [vmem:[%s3740_s5 + $0x58] sm:$0xff]  }
 0x20b   : > { %v753_v39 = vmax.f32 %v724_v27, 0.0 }
 0x20c   : > { %v766_v40 = vpack.c.bf16 %v752_v30, %v750_v29 }
 0x20d   : > { %v767_v36 = vpack.c.bf16 %v753_v39, %v751_v38  ;;  %1651 = vmatpush1.bf16.msra.mxu0 %v2849_v28  ;;  %v2883_v38 = vld [vmem:[%s3740_s5 + $0x18] sm:$0xff]  }
 0x20e   : > { %1652 = vmatprep.subr.bf16.mxu0 %v2857_v34 }
 0x20f   : > { %1065 = vmatprep.mubr.bf16.mxu0 %v767_v36  ;;  %v2884_v36 = vld [vmem:[%s3740_s5 + $0x60] sm:$0xff]  }
 0x210   : > { %1066 = vmatmul.mubr.bf16.gmra.mrb[52].mxu0 %v766_v40 }
 0x211   : > { %1653 = vmatpush1.bf16.msra.mxu0 %v2855_v37 }
 0x212   : > { %1654 = vmatprep.subr.bf16.mxu0 %v2863_v41 }
 0x215   : > { %1655 = vmatpush1.bf16.msra.mxu0 %v2861_v42 }
 0x216   : > { %1656 = vmatprep.subr.bf16.mxu0 %v2869_v44 }
 0x219   : > { %1657 = vmatpush1.bf16.msra.mxu0 %v2867_v46 }
 0x21a   : > { %1658 = vmatprep.subr.bf16.mxu0 %v2875_v48  ;;  %v2886_v48 = vld [vmem:[%s3740_s5 + $0x68] sm:$0xff]  }
 0x21d   : > { %1659 = vmatpush1.bf16.msra.mxu0 %v2873_v50 }
 0x21e   : > { %2506 = vmatprep.subr.bf16.mxu0 %v2876_v51 }
 0x2b3   : > { %v1007_v55 = vpop.f32.mrb[28].mxu0 }
 0x2b4   : > { %v1008_v56 = vadd.f32 %v1007_v55, %v3442_v53  ;;  %v1009_v57 = vpop.f32.mrb[29].mxu0 }
 0x2b5   : > { %v1010_v58 = vadd.f32 %v1009_v57, %v3445_v54  ;;  %v1011_v59 = vpop.f32.mrb[30].mxu0 }
 0x2b6   : > { %v1012_v60 = vadd.f32 %v1011_v59, %v3442_v53  ;;  %v1013_v62 = vpop.f32.mrb[31].mxu0  ;;  %v1076_v0 = vmax.f32 %v1008_v56, 0.0 }
 0x2b7   : > { %v1014_v63 = vadd.f32 %v1013_v62, %v3445_v54  ;;  %v1077_v61 = vmax.f32 %v1010_v58, 0.0 }
 0x2b8   : > { %v1078_v32 = vmax.f32 %v1012_v60, 0.0 }
 0x2b9   : > { %v1079_v1 = vmax.f32 %v1014_v63, 0.0 }
 0x2ba   : > { %v1104_v2 = vpack.c.bf16 %v1078_v32, %v1076_v0 }
 0x2bb   : > { %v1105_v3 = vpack.c.bf16 %v1079_v1, %v1077_v61  ;;  %v1017_v4 = vpop.f32.mrb[32].mxu0 }
 0x2bc   : > { %v1018_v6 = vadd.f32 %v1017_v4, %v3442_v53  ;;  %v1019_v7 = vpop.f32.mrb[33].mxu0 }
 0x2bd   : > { %v1020_v9 = vadd.f32 %v1019_v7, %v3445_v54  ;;  %v1021_v10 = vpop.f32.mrb[34].mxu0  ;;  %1557 = vmatprep.mubr.bf16.mxu1 %v1105_v3  ;;  %1660 = vmatprep.mubr.bf16.mxu0 %v1105_v3 }
 0x2be   : > { %v1022_v11 = vadd.f32 %v1021_v10, %v3442_v53  ;;  %v1023_v12 = vpop.f32.mrb[35].mxu0  ;;  %1558 = vmatmul.mubr.bf16.vlgmr.msra.gmra.mrb[28].mxu1 %v1104_v2  ;;  %1661 = vmatmul.mubr.bf16.vlgmr.msra.gmra.mrb[56].mxu0 %v1104_v2  ;;  %v1080_v15 = vmax.f32 %v1018_v6, 0.0 }
 0x2bf   : > { %v1024_v13 = vadd.f32 %v1023_v12, %v3445_v54  ;;  %2674 = vmatpush3.bf16.msra.mxu1 %v2877_v5  ;;  %2507 = vmatpush3.bf16.msra.mxu0 %v2877_v5  ;;  %v1081_v18 = vmax.f32 %v1020_v9, 0.0 }
 0x2c0   : > { %v1082_v16 = vmax.f32 %v1022_v11, 0.0  ;;  %2508 = vmatprep.subr.bf16.mxu0 %v2878_v8  ;;  %2667 = vmatprep.subr.bf16.mxu1 %v2878_v8 }
 0x2c1   : > { %v1083_v19 = vmax.f32 %v1024_v13, 0.0 }
 0x2c2   : > { %v1106_v20 = vpack.c.bf16 %v1082_v16, %v1080_v15 }
 0x2c3   : > { %v1107_v21 = vpack.c.bf16 %v1083_v19, %v1081_v18  ;;  %v1027_v22 = vpop.f32.mrb[36].mxu0  ;;  %2509 = vmatpush3.bf16.msra.mxu0 %v2879_v14  ;;  %2675 = vmatpush3.bf16.msra.mxu1 %v2879_v14 }
 0x2c4   : > { %v1028_v24 = vadd.f32 %v1027_v22, %v3442_v53  ;;  %v1029_v25 = vpop.f32.mrb[37].mxu0  ;;  %2510 = vmatprep.subr.bf16.mxu0 %v2880_v17  ;;  %2668 = vmatprep.subr.bf16.mxu1 %v2880_v17 }
 0x2c5   : > { %v1030_v27 = vadd.f32 %v1029_v25, %v3445_v54  ;;  %v1031_v28 = vpop.f32.mrb[38].mxu0  ;;  %1567 = vmatprep.mubr.bf16.mxu1 %v1107_v21  ;;  %1670 = vmatprep.mubr.bf16.mxu0 %v1107_v21 }
 0x2c6   : > { %v1032_v29 = vadd.f32 %v1031_v28, %v3442_v53  ;;  %v1033_v30 = vpop.f32.mrb[39].mxu0  ;;  %1568 = vmatmul.mubr.bf16.gmra.mrb[32].mxu1 %v1106_v20  ;;  %1671 = vmatmul.mubr.bf16.gmra.mrb[60].mxu0 %v1106_v20  ;;  %v1084_v39 = vmax.f32 %v1028_v24, 0.0 }
 0x2c7   : > { %v1034_v34 = vadd.f32 %v1033_v30, %v3445_v54  ;;  %2511 = vmatpush3.bf16.msra.mxu0 %v2881_v23  ;;  %2676 = vmatpush3.bf16.msra.mxu1 %v2881_v23  ;;  %v1085_v37 = vmax.f32 %v1030_v27, 0.0 }
 0x2c8   : > { %v1086_v40 = vmax.f32 %v1032_v29, 0.0  ;;  %2512 = vmatprep.subr.bf16.mxu0 %v2882_v26  ;;  %2669 = vmatprep.subr.bf16.mxu1 %v2882_v26 }
 0x2c9   : > { %v1087_v41 = vmax.f32 %v1034_v34, 0.0 }
 0x2ca   : > { %v1108_v42 = vpack.c.bf16 %v1086_v40, %v1084_v39 }
 0x2cb   : > { %v1109_v43 = vpack.c.bf16 %v1087_v41, %v1085_v37  ;;  %v1037_v44 = vpop.f32.mrb[40].mxu0  ;;  %2513 = vmatpush3.bf16.msra.mxu0 %v2883_v38  ;;  %2677 = vmatpush3.bf16.msra.mxu1 %v2883_v38 }
 0x2cc   : > { %v1038_v46 = vadd.f32 %v1037_v44, %v3442_v53  ;;  %v1039_v47 = vpop.f32.mrb[41].mxu0  ;;  %2514 = vmatprep.subr.bf16.mxu0 %v2884_v36  ;;  %2670 = vmatprep.subr.bf16.mxu1 %v2884_v36  ;;  %v2890_v44 = vld [vmem:[%s3740_s5 + $0x78] sm:$0xff]  }
 0x2cd   : > { %v1040_v49 = vadd.f32 %v1039_v47, %v3445_v54  ;;  %v1041_v50 = vpop.f32.mrb[42].mxu0  ;;  %1577 = vmatprep.mubr.bf16.mxu1 %v1109_v43  ;;  %1680 = vmatprep.mubr.bf16.mxu0 %v1109_v43  ;;  %v2887_v43 = vld [vmem:[%s3740_s5 + $0x28] sm:$0xff]   ;;  %v1195_v47 = vsub.s32 2, %v3285_v31 }
 0x2ce   : > { %v1042_v51 = vadd.f32 %v1041_v50, %v3442_v53  ;;  %v1043_v52 = vpop.f32.mrb[43].mxu0  ;;  %1578 = vmatmul.mubr.bf16.gmra.mrb[36].mxu1 %v1108_v42  ;;  %1681 = vmatmul.mubr.bf16.gmra.mrb[64].mxu0 %v1108_v42  ;;  %v1088_v56 = vmax.f32 %v1038_v46, 0.0  ;;  %v2892_v46 = vld [vmem:[%s3740_s5 + $0xc0] sm:$0xff]  }
 0x2cf   : > { %v1044_v55 = vadd.f32 %v1043_v52, %v3445_v54  ;;  %2515 = vmatpush3.bf16.msra.mxu0 %v2885_v45  ;;  %2678 = vmatpush3.bf16.msra.mxu1 %v2885_v45  ;;  %v1089_v58 = vmax.f32 %v1040_v49, 0.0  ;;  %v2891_v45 = vld [vmem:[%s3740_s5 + $0x38] sm:$0xff]   ;;  %v1199_v49 = vsub.s32 3, %v3285_v31 }
 0x2d0   : > { %v1090_v57 = vmax.f32 %v1042_v51, 0.0  ;;  %2516 = vmatprep.subr.bf16.mxu0 %v2886_v48  ;;  %2671 = vmatprep.subr.bf16.mxu1 %v2886_v48  ;;  %v2392_v48 = vld [vmem:[%s3741_s6 + $0x3] ss:$8 sm:$0xf] }
 0x2d1   : > { %v1091_v59 = vmax.f32 %v1044_v55, 0.0  ;;  %v3529_v50 = vrot.slane %v2392_v48, %v3288_v33  ;;  %v3531_v51 = vrot.slane %v2392_v48, %v1195_v47  ;;  %v3534_v52 = vrot.slane %v2392_v48, %v3294_v35 }
 0x2d2   : > { %v1110_v60 = vpack.c.bf16 %v1090_v57, %v1088_v56  ;;  %v3536_v55 = vrot.slane %v2392_v48, %v1199_v49 }
 0x2d3   : > { %v1111_v62 = vpack.c.bf16 %v1091_v59, %v1089_v58  ;;  %v1047_v63 = vpop.f32.mrb[44].mxu0  ;;  %2517 = vmatpush3.bf16.msra.mxu0 %v2887_v43  ;;  %2679 = vmatpush3.bf16.msra.mxu1 %v2887_v43 }
 0x2d4   : > { %v1048_v0 = vadd.f32 %v1047_v63, %v3442_v53  ;;  %v1049_v32 = vpop.f32.mrb[45].mxu0 }
 0x2d5   : > { %v1050_v61 = vadd.f32 %v1049_v32, %v3445_v54  ;;  %v1051_v1 = vpop.f32.mrb[46].mxu0  ;;  %1587 = vmatprep.mubr.bf16.mxu1 %v1111_v62  ;;  %1690 = vmatprep.mubr.bf16.mxu0 %v1111_v62 }
 0x2d6   : > { %v1052_v2 = vadd.f32 %v1051_v1, %v3442_v53  ;;  %v1053_v3 = vpop.f32.mrb[47].mxu0  ;;  %1588 = vmatmul.mubr.bf16.gmra.mrb[40].mxu1 %v1110_v60  ;;  %1691 = vmatmul.mubr.bf16.gmra.mrb[68].mxu0 %v1110_v60  ;;  %v1092_v5 = vmax.f32 %v1048_v0, 0.0 }
 0x2d7   : > { %v1054_v4 = vadd.f32 %v1053_v3, %v3445_v54  ;;  %v1093_v7 = vmax.f32 %v1050_v61, 0.0 }
 0x2d8   : > { %v1094_v6 = vmax.f32 %v1052_v2, 0.0 }
 0x2d9   : > { %v1095_v8 = vmax.f32 %v1054_v4, 0.0 }
 0x2da   : > { %v1112_v9 = vpack.c.bf16 %v1094_v6, %v1092_v5 }
 0x2db   : > { %v1113_v10 = vpack.c.bf16 %v1095_v8, %v1093_v7  ;;  %v1057_v11 = vpop.f32.mrb[48].mxu0 }
 0x2dc   : > { %v1058_v12 = vadd.f32 %v1057_v11, %v3442_v53  ;;  %v1059_v13 = vpop.f32.mrb[49].mxu0 }
 0x2dd   : > { %v1060_v14 = vadd.f32 %v1059_v13, %v3445_v54  ;;  %v1061_v15 = vpop.f32.mrb[50].mxu0  ;;  %1597 = vmatprep.mubr.bf16.mxu1 %v1113_v10  ;;  %1700 = vmatprep.mubr.bf16.mxu0 %v1113_v10 }
 0x2de   : > { %v1062_v16 = vadd.f32 %v1061_v15, %v3442_v53  ;;  %v1063_v17 = vpop.f32.mrb[51].mxu0  ;;  %1598 = vmatmul.mubr.bf16.gmra.mrb[44].mxu1 %v1112_v9  ;;  %1701 = vmatmul.mubr.bf16.gmra.mrb[72].mxu0 %v1112_v9  ;;  %v1096_v19 = vmax.f32 %v1058_v12, 0.0 }
 0x2df   : > { %v1064_v18 = vadd.f32 %v1063_v17, %v3445_v54  ;;  %v1097_v21 = vmax.f32 %v1060_v14, 0.0 }
 0x2e0   : > { %v1098_v20 = vmax.f32 %v1062_v16, 0.0 }
 0x2e1   : > { %v1099_v22 = vmax.f32 %v1064_v18, 0.0 }
 0x2e2   : > { %v1114_v23 = vpack.c.bf16 %v1098_v20, %v1096_v19 }
 0x2e3   : > { %v1115_v24 = vpack.c.bf16 %v1099_v22, %v1097_v21  ;;  %v1067_v25 = vpop.f32.mrb[52].mxu0 }
 0x2e4   : > { %v1068_v26 = vadd.f32 %v1067_v25, %v3442_v53  ;;  %v1069_v27 = vpop.f32.mrb[53].mxu0 }
 0x2e5   : > { %v1070_v28 = vadd.f32 %v1069_v27, %v3445_v54  ;;  %v1071_v29 = vpop.f32.mrb[54].mxu0  ;;  %1607 = vmatprep.mubr.bf16.mxu1 %v1115_v24  ;;  %1710 = vmatprep.mubr.bf16.mxu0 %v1115_v24 }
 0x2e6   : > { %v1072_v30 = vadd.f32 %v1071_v29, %v3442_v53  ;;  %v1073_v34 = vpop.f32.mrb[55].mxu0  ;;  %1608 = vmatmul.mubr.bf16.gmra.mrb[48].mxu1 %v1114_v23  ;;  %1711 = vmatmul.mubr.bf16.gmra.mrb[76].mxu0 %v1114_v23  ;;  %v1100_v39 = vmax.f32 %v1068_v26, 0.0  ;;  %v2888_v53 = vld [vmem:[%s3740_s5 + $0x70] sm:$0xff]  }
 0x2e7   : > { %v1074_v38 = vadd.f32 %v1073_v34, %v3445_v54  ;;  %v1101_v36 = vmax.f32 %v1070_v28, 0.0  ;;  %v2889_v54 = vld [vmem:[%s3740_s5 + $0x30] sm:$0xff]   ;;  %2518 = vmatprep.subr.bf16.mxu0 %v2888_v53  ;;  %2672 = vmatprep.subr.bf16.mxu1 %v2888_v53 }
 0x2e8   : > { %v1102_v40 = vmax.f32 %v1072_v30, 0.0  ;;  %2519 = vmatpush3.bf16.msra.mxu0 %v2889_v54  ;;  %2680 = vmatpush3.bf16.msra.mxu1 %v2889_v54 }
 0x2e9   : > { %v1103_v37 = vmax.f32 %v1074_v38, 0.0  ;;  %2520 = vmatprep.subr.bf16.mxu0 %v2890_v44  ;;  %2673 = vmatprep.subr.bf16.mxu1 %v2890_v44 }
 0x2ea   : > { %v1116_v41 = vpack.c.bf16 %v1102_v40, %v1100_v39 }
 0x2eb   : > { %v1117_v42 = vpack.c.bf16 %v1103_v37, %v1101_v36 }
 0x2ec   : > { %2521 = vmatpush3.bf16.msra.mxu0 %v2891_v45  ;;  %2681 = vmatpush3.bf16.msra.mxu1 %v2891_v45 }
 0x2ed   : > { %1617 = vmatprep.mubr.bf16.mxu1 %v1117_v42  ;;  %1720 = vmatprep.mubr.bf16.mxu0 %v1117_v42 }
 0x2ee   : > { %1618 = vmatmul.mubr.bf16.gmra.mrb[52].mxu1 %v1116_v41  ;;  %1721 = vmatmul.mubr.bf16.gmra.mrb[80].mxu0 %v1116_v41 }
 0x2ef   : > { %2564 = vmatprep.subr.bf16.mxu1 %v2892_v46 }
 0x391   : > { %v1559_v56 = vpop.f32.mrb[28].mxu1  ;;  %v1662_v57 = vpop.f32.mrb[56].mxu0 }
 0x392   : > { %v1560_v58 = vadd.f32 %v1559_v56, %v3529_v50  ;;  %v1663_v59 = vadd.f32 %v1662_v57, %v3531_v51  ;;  %v1561_v60 = vpop.f32.mrb[29].mxu1  ;;  %v1664_v62 = vpop.f32.mrb[57].mxu0 }
 0x393   : > { %v1562_v31 = vadd.f32 %v1561_v60, %v3534_v52  ;;  %v1665_v33 = vadd.f32 %v1664_v62, %v3536_v55  ;;  %v1563_v63 = vpop.f32.mrb[30].mxu1  ;;  %v1666_v0 = vpop.f32.mrb[58].mxu0 }
 0x394   : > { %v1564_v32 = vadd.f32 %v1563_v63, %v3529_v50  ;;  %v1667_v35 = vadd.f32 %v1666_v0, %v3531_v51  ;;  %v1565_v61 = vpop.f32.mrb[31].mxu1  ;;  %v1668_v1 = vpop.f32.mrb[59].mxu0  ;;  %v1731_v4 = vmax.f32 %v1560_v58, 0.0  ;;  %v1733_v5 = vmax.f32 %v1663_v59, 0.0 }
 0x395   : > { %v1566_v2 = vadd.f32 %v1565_v61, %v3534_v52  ;;  %v1669_v3 = vadd.f32 %v1668_v1, %v3536_v55  ;;  %v1732_v8 = vmax.f32 %v1562_v31, 0.0  ;;  %v1734_v9 = vmax.f32 %v1665_v33, 0.0 }
 0x396   : > { %v1735_v6 = vmax.f32 %v1564_v32, 0.0  ;;  %v1737_v7 = vmax.f32 %v1667_v35, 0.0 }
 0x397   : > { %v1736_v10 = vmax.f32 %v1566_v2, 0.0  ;;  %v1738_v11 = vmax.f32 %v1669_v3, 0.0 }
 0x398   : > { %v1787_v12 = vpack.c.bf16 %v1735_v6, %v1731_v4  ;;  %v3546_v13 = vpack.c.bf16 %v1737_v7, %v1733_v5 }
 0x399   : > { %v1788_v14 = vpack.c.bf16 %v1736_v10, %v1732_v8  ;;  %v3548_v15 = vpack.c.bf16 %v1738_v11, %v1734_v9  ;;  %v1569_v16 = vpop.f32.mrb[32].mxu1  ;;  %v1672_v17 = vpop.f32.mrb[60].mxu0 }
 0x39a   : > { %v1570_v18 = vadd.f32 %v1569_v16, %v3529_v50  ;;  %v1673_v19 = vadd.f32 %v1672_v17, %v3531_v51  ;;  %v1571_v20 = vpop.f32.mrb[33].mxu1  ;;  %v1674_v21 = vpop.f32.mrb[61].mxu0 }
 0x39b   : > { %v1572_v22 = vadd.f32 %v1571_v20, %v3534_v52  ;;  %v1675_v23 = vadd.f32 %v1674_v21, %v3536_v55  ;;  %v1573_v24 = vpop.f32.mrb[34].mxu1  ;;  %v1676_v25 = vpop.f32.mrb[62].mxu0  ;;  %2104 = vmatprep.mubr.bf16.mxu0 %v1788_v14 }
 0x39c   : > { %v1574_v26 = vadd.f32 %v1573_v24, %v3529_v50  ;;  %v1677_v27 = vadd.f32 %v1676_v25, %v3531_v51  ;;  %v1575_v28 = vpop.f32.mrb[35].mxu1  ;;  %v1678_v29 = vpop.f32.mrb[63].mxu0  ;;  %2105 = vmatmul.mubr.bf16.vlgmr.msra.gmra.mrb[84].mxu0 %v1787_v12  ;;  %v1739_v38 = vmax.f32 %v1570_v18, 0.0  ;;  %v1741_v39 = vmax.f32 %v1673_v19, 0.0 }
 0x39d   : > { %v1576_v30 = vadd.f32 %v1575_v28, %v3534_v52  ;;  %v1679_v34 = vadd.f32 %v1678_v29, %v3536_v55  ;;  %v1740_v37 = vmax.f32 %v1572_v22, 0.0  ;;  %v1742_v41 = vmax.f32 %v1675_v23, 0.0 }
 0x39e   : > { %v1743_v40 = vmax.f32 %v1574_v26, 0.0  ;;  %v1745_v36 = vmax.f32 %v1677_v27, 0.0 }
 0x39f   : > { %v1744_v42 = vmax.f32 %v1576_v30, 0.0  ;;  %v1746_v43 = vmax.f32 %v1679_v34, 0.0 }
 0x3a0   : > { %v1791_v53 = vpack.c.bf16 %v1743_v40, %v1739_v38  ;;  %v3558_v54 = vpack.c.bf16 %v1745_v36, %v1741_v39 }
 0x3a1   : > { %v1792_v44 = vpack.c.bf16 %v1744_v42, %v1740_v37  ;;  %v3560_v45 = vpack.c.bf16 %v1746_v43, %v1742_v41  ;;  %v1579_v46 = vpop.f32.mrb[36].mxu1  ;;  %v1682_v47 = vpop.f32.mrb[64].mxu0 }
 0x3a2   : > { %v1580_v48 = vadd.f32 %v1579_v46, %v3529_v50  ;;  %v1683_v49 = vadd.f32 %v1682_v47, %v3531_v51  ;;  %v1581_v56 = vpop.f32.mrb[37].mxu1  ;;  %v1684_v57 = vpop.f32.mrb[65].mxu0 }
 0x3a3   : > { %v1582_v58 = vadd.f32 %v1581_v56, %v3534_v52  ;;  %v1685_v59 = vadd.f32 %v1684_v57, %v3536_v55  ;;  %v1583_v60 = vpop.f32.mrb[38].mxu1  ;;  %v1686_v62 = vpop.f32.mrb[66].mxu0  ;;  %2112 = vmatprep.mubr.bf16.mxu0 %v1792_v44 }
 0x3a4   : > { %v1584_v31 = vadd.f32 %v1583_v60, %v3529_v50  ;;  %v1687_v33 = vadd.f32 %v1686_v62, %v3531_v51  ;;  %v1585_v63 = vpop.f32.mrb[39].mxu1  ;;  %v1688_v0 = vpop.f32.mrb[67].mxu0  ;;  %2113 = vmatmul.mubr.bf16.gmra.mrb[88].mxu0 %v1791_v53  ;;  %v1747_v61 = vmax.f32 %v1580_v48, 0.0  ;;  %v1749_v1 = vmax.f32 %v1683_v49, 0.0  ;;  %v2893_v48 = vld [vmem:[%s3740_s5 + $0x80] sm:$0xff]  }
 0x3a5   : > { %v1586_v32 = vadd.f32 %v1585_v63, %v3534_v52  ;;  %v1689_v35 = vadd.f32 %v1688_v0, %v3536_v55  ;;  %v1748_v4 = vmax.f32 %v1582_v58, 0.0  ;;  %v1750_v5 = vmax.f32 %v1685_v59, 0.0  ;;  %v2894_v59 = vld [vmem:[%s3740_s5 + $0xc8] sm:$0xff]  }
 0x3a6   : > { %v1751_v2 = vmax.f32 %v1584_v31, 0.0  ;;  %v1753_v3 = vmax.f32 %v1687_v33, 0.0 }
 0x3a7   : > { %v1752_v6 = vmax.f32 %v1586_v32, 0.0  ;;  %v1754_v7 = vmax.f32 %v1689_v35, 0.0 }
 0x3a8   : > { %v1795_v8 = vpack.c.bf16 %v1751_v2, %v1747_v61  ;;  %v3570_v9 = vpack.c.bf16 %v1753_v3, %v1749_v1  ;;  %v2895_v2 = vld [vmem:[%s3740_s5 + $0x88] sm:$0xff]  }
 0x3a9   : > { %v1796_v10 = vpack.c.bf16 %v1752_v6, %v1748_v4  ;;  %v3572_v11 = vpack.c.bf16 %v1754_v7, %v1750_v5  ;;  %v1589_v12 = vpop.f32.mrb[40].mxu1  ;;  %v1692_v14 = vpop.f32.mrb[68].mxu0  ;;  %v2896_v7 = vld [vmem:[%s3740_s5 + $0xd0] sm:$0xff]  }
 0x3aa   : > { %v1590_v16 = vadd.f32 %v1589_v12, %v3529_v50  ;;  %v1693_v17 = vadd.f32 %v1692_v14, %v3531_v51  ;;  %v1591_v18 = vpop.f32.mrb[41].mxu1  ;;  %v1694_v19 = vpop.f32.mrb[69].mxu0 }
 0x3ab   : > { %v1592_v20 = vadd.f32 %v1591_v18, %v3534_v52  ;;  %v1695_v21 = vadd.f32 %v1694_v19, %v3536_v55  ;;  %v1593_v22 = vpop.f32.mrb[42].mxu1  ;;  %v1696_v23 = vpop.f32.mrb[70].mxu0  ;;  %2120 = vmatprep.mubr.bf16.mxu0 %v1796_v10 }
 0x3ac   : > { %v1594_v24 = vadd.f32 %v1593_v22, %v3529_v50  ;;  %v1697_v25 = vadd.f32 %v1696_v23, %v3531_v51  ;;  %v1595_v26 = vpop.f32.mrb[43].mxu1  ;;  %v1698_v27 = vpop.f32.mrb[71].mxu0  ;;  %2121 = vmatmul.mubr.bf16.gmra.mrb[92].mxu0 %v1795_v8  ;;  %v1755_v30 = vmax.f32 %v1590_v16, 0.0  ;;  %v1757_v34 = vmax.f32 %v1693_v17, 0.0  ;;  %v2897_v22 = vld [vmem:[%s3740_s5 + $0x90] sm:$0xff]  }
 0x3ad   : > { %v1596_v28 = vadd.f32 %v1595_v26, %v3534_v52  ;;  %v1699_v29 = vadd.f32 %v1698_v27, %v3536_v55  ;;  %v1756_v40 = vmax.f32 %v1592_v20, 0.0  ;;  %v1758_v36 = vmax.f32 %v1695_v21, 0.0  ;;  %v2898_v27 = vld [vmem:[%s3740_s5 + $0xd8] sm:$0xff]  }
 0x3ae   : > { %v1759_v38 = vmax.f32 %v1594_v24, 0.0  ;;  %v1761_v39 = vmax.f32 %v1697_v25, 0.0 }
 0x3af   : > { %v1760_v37 = vmax.f32 %v1596_v28, 0.0  ;;  %v1762_v41 = vmax.f32 %v1699_v29, 0.0 }
 0x3b0   : > { %v1799_v42 = vpack.c.bf16 %v1759_v38, %v1755_v30  ;;  %v3582_v43 = vpack.c.bf16 %v1761_v39, %v1757_v34 }
 0x3b1   : > { %v1800_v53 = vpack.c.bf16 %v1760_v37, %v1756_v40  ;;  %v3584_v44 = vpack.c.bf16 %v1762_v41, %v1758_v36  ;;  %v1599_v46 = vpop.f32.mrb[44].mxu1  ;;  %v1702_v47 = vpop.f32.mrb[72].mxu0 }
 0x3b2   : > { %v1600_v49 = vadd.f32 %v1599_v46, %v3529_v50  ;;  %v1703_v56 = vadd.f32 %v1702_v47, %v3531_v51  ;;  %v1601_v57 = vpop.f32.mrb[45].mxu1  ;;  %v1704_v58 = vpop.f32.mrb[73].mxu0 }
 0x3b3   : > { %v1602_v60 = vadd.f32 %v1601_v57, %v3534_v52  ;;  %v1705_v62 = vadd.f32 %v1704_v58, %v3536_v55  ;;  %v1603_v31 = vpop.f32.mrb[46].mxu1  ;;  %v1706_v33 = vpop.f32.mrb[74].mxu0  ;;  %2128 = vmatprep.mubr.bf16.mxu1 %v1800_v53 }
 0x3b4   : > { %v1604_v63 = vadd.f32 %v1603_v31, %v3529_v50  ;;  %v1707_v0 = vadd.f32 %v1706_v33, %v3531_v51  ;;  %v1605_v32 = vpop.f32.mrb[47].mxu1  ;;  %v1708_v35 = vpop.f32.mrb[75].mxu0  ;;  %2129 = vmatmul.mubr.bf16.vlgmr.msra.gmra.mrb[56].mxu1 %v1799_v42  ;;  %v1763_v3 = vmax.f32 %v1600_v49, 0.0  ;;  %v1765_v4 = vmax.f32 %v1703_v56, 0.0  ;;  %v2899_v42 = vld [vmem:[%s3740_s5 + $0x98] sm:$0xff]   ;;  %v2900_v49 = vld [vmem:[%s3740_s5 + $0xe0] sm:$0xff]  }
 0x3b5   : > { %v1606_v61 = vadd.f32 %v1605_v32, %v3534_v52  ;;  %v1709_v1 = vadd.f32 %v1708_v35, %v3536_v55  ;;  %2565 = vmatpush3.bf16.msra.mxu1 %v2893_v48  ;;  %v1764_v8 = vmax.f32 %v1602_v60, 0.0  ;;  %v1766_v10 = vmax.f32 %v1705_v62, 0.0  ;;  %v2901_v32 = vld [vmem:[%s3740_s5 + $0xa0] sm:$0xff]  }
 0x3b6   : > { %v1767_v5 = vmax.f32 %v1604_v63, 0.0  ;;  %v1769_v6 = vmax.f32 %v1707_v0, 0.0  ;;  %2566 = vmatprep.subr.bf16.mxu1 %v2894_v59 }
 0x3b7   : > { %v1768_v12 = vmax.f32 %v1606_v61, 0.0  ;;  %v1770_v14 = vmax.f32 %v1709_v1, 0.0 }
 0x3b8   : > { %v1803_v16 = vpack.c.bf16 %v1767_v5, %v1763_v3  ;;  %v3606_v17 = vpack.c.bf16 %v1769_v6, %v1765_v4  ;;  %v2902_v3 = vld [vmem:[%s3740_s5 + $0xe8] sm:$0xff]  }
 0x3b9   : > { %v1804_v18 = vpack.c.bf16 %v1768_v12, %v1764_v8  ;;  %v3608_v19 = vpack.c.bf16 %v1770_v14, %v1766_v10  ;;  %2567 = vmatpush3.bf16.msra.mxu1 %v2895_v2  ;;  %v1609_v20 = vpop.f32.mrb[48].mxu1  ;;  %v1712_v21 = vpop.f32.mrb[76].mxu0 }
 0x3ba   : > { %v1610_v23 = vadd.f32 %v1609_v20, %v3529_v50  ;;  %v1713_v24 = vadd.f32 %v1712_v21, %v3531_v51  ;;  %v1611_v25 = vpop.f32.mrb[49].mxu1  ;;  %v1714_v26 = vpop.f32.mrb[77].mxu0  ;;  %2568 = vmatprep.subr.bf16.mxu1 %v2896_v7  ;;  %v2903_v20 = vld [vmem:[%s3740_s5 + $0xa8] sm:$0xff]  }
 0x3bb   : > { %v1612_v28 = vadd.f32 %v1611_v25, %v3534_v52  ;;  %v1715_v29 = vadd.f32 %v1714_v26, %v3536_v55  ;;  %v1613_v30 = vpop.f32.mrb[50].mxu1  ;;  %v1716_v34 = vpop.f32.mrb[78].mxu0  ;;  %2136 = vmatprep.mubr.bf16.mxu1 %v1804_v18 }
 0x3bc   : > { %v1614_v38 = vadd.f32 %v1613_v30, %v3529_v50  ;;  %v1717_v39 = vadd.f32 %v1716_v34, %v3531_v51  ;;  %v1615_v40 = vpop.f32.mrb[51].mxu1  ;;  %v1718_v36 = vpop.f32.mrb[79].mxu0  ;;  %2137 = vmatmul.mubr.bf16.gmra.mrb[60].mxu1 %v1803_v16  ;;  %v1771_v53 = vmax.f32 %v1610_v23, 0.0  ;;  %v1773_v46 = vmax.f32 %v1713_v24, 0.0  ;;  %v2905_v30 = vld [vmem:[%s3740_s5 + $0xb0] sm:$0xff]   ;;  %v2906_v34 = vld [vmem:[%s3740_s5 + $0xf8] sm:$0xff]  }
 0x3bd   : > { %v1616_v37 = vadd.f32 %v1615_v40, %v3534_v52  ;;  %v1719_v41 = vadd.f32 %v1718_v36, %v3536_v55  ;;  %2569 = vmatpush3.bf16.msra.mxu1 %v2897_v22  ;;  %v1772_v56 = vmax.f32 %v1612_v28, 0.0  ;;  %v1774_v57 = vmax.f32 %v1715_v29, 0.0 }
 0x3be   : > { %v1775_v47 = vmax.f32 %v1614_v38, 0.0  ;;  %v1777_v48 = vmax.f32 %v1717_v39, 0.0  ;;  %2570 = vmatprep.subr.bf16.mxu1 %v2898_v27  ;;  %v2907_v38 = vld [vmem:[%s3740_s5 + $0xb8] sm:$0xff]  }
 0x3bf   : > { %v1776_v58 = vmax.f32 %v1616_v37, 0.0  ;;  %v1778_v59 = vmax.f32 %v1719_v41, 0.0 }
 0x3c0   : > { %v1807_v60 = vpack.c.bf16 %v1775_v47, %v1771_v53  ;;  %v1809_v62 = vpack.c.bf16 %v1777_v48, %v1773_v46 }
 0x3c1   : > { %v1808_v31 = vpack.c.bf16 %v1776_v58, %v1772_v56  ;;  %v1810_v33 = vpack.c.bf16 %v1778_v59, %v1774_v57  ;;  %2571 = vmatpush3.bf16.msra.mxu1 %v2899_v42  ;;  %v1619_v63 = vpop.f32.mrb[52].mxu1  ;;  %v1722_v0 = vpop.f32.mrb[80].mxu0 }
 0x3c2   : > { %v1620_v35 = vadd.f32 %v1619_v63, %v3529_v50  ;;  %v1723_v61 = vadd.f32 %v1722_v0, %v3531_v51  ;;  %v1621_v1 = vpop.f32.mrb[53].mxu1  ;;  %v1724_v2 = vpop.f32.mrb[81].mxu0  ;;  %2572 = vmatprep.subr.bf16.mxu1 %v2900_v49 }
 0x3c3   : > { %v1622_v4 = vadd.f32 %v1621_v1, %v3534_v52  ;;  %v1725_v5 = vadd.f32 %v1724_v2, %v3536_v55  ;;  %v1623_v6 = vpop.f32.mrb[54].mxu1  ;;  %v1726_v7 = vpop.f32.mrb[82].mxu0  ;;  %2144 = vmatprep.mubr.bf16.mxu1 %v1808_v31 }
 0x3c4   : > { %v1624_v8 = vadd.f32 %v1623_v6, %v3529_v50  ;;  %v1727_v10 = vadd.f32 %v1726_v7, %v3531_v51  ;;  %v1625_v12 = vpop.f32.mrb[55].mxu1  ;;  %v1728_v14 = vpop.f32.mrb[83].mxu0  ;;  %2145 = vmatmul.mubr.bf16.gmra.mrb[64].mxu1 %v1807_v60  ;;  %v1779_v21 = vmax.f32 %v1620_v35, 0.0  ;;  %v1781_v22 = vmax.f32 %v1723_v61, 0.0  ;;  %v2904_v50 = vld [vmem:[%s3740_s5 + $0xf0] sm:$0xff]  }
 0x3c5   : > { %v1626_v16 = vadd.f32 %v1625_v12, %v3534_v52  ;;  %v1729_v18 = vadd.f32 %v1728_v14, %v3536_v55  ;;  %2573 = vmatpush3.bf16.msra.mxu1 %v2901_v32  ;;  %v1780_v51 = vmax.f32 %v1622_v4, 0.0  ;;  %v1782_v25 = vmax.f32 %v1725_v5, 0.0 }
 0x3c6   : > { %v1783_v23 = vmax.f32 %v1624_v8, 0.0  ;;  %v1785_v24 = vmax.f32 %v1727_v10, 0.0  ;;  %2574 = vmatprep.subr.bf16.mxu1 %v2902_v3  ;;  %v3688_v10 = vld [vmem:[%s3741_s6 + $0x4] ss:$0 sm:$0xff] }
 0x3c7   : > { %v1784_v26 = vmax.f32 %v1626_v16, 0.0  ;;  %v1786_v52 = vmax.f32 %v1729_v18, 0.0 }
 0x3c8   : > { %v1811_v27 = vpack.c.bf16 %v1783_v23, %v1779_v21  ;;  %v1813_v55 = vpack.c.bf16 %v1785_v24, %v1781_v22 }
 0x3c9   : > { %v1812_v28 = vpack.c.bf16 %v1784_v26, %v1780_v51  ;;  %v1814_v29 = vpack.c.bf16 %v1786_v52, %v1782_v25  ;;  %2575 = vmatpush3.bf16.msra.mxu1 %v2903_v20 }
 0x3ca   : > { %2576 = vmatprep.subr.bf16.mxu1 %v2904_v50 }
 0x3cb   : > { %2152 = vmatprep.mubr.bf16.mxu1 %v1812_v28 }
 0x3cc   : > { %2153 = vmatmul.mubr.bf16.gmra.mrb[68].mxu1 %v1811_v27 }
 0x3cd   : > { %2577 = vmatpush3.bf16.msra.mxu1 %v2905_v30  ;;  %2193 = vmatprep.mubr.bf16.mxu1 %v3548_v15 }
 0x3ce   : > { %2578 = vmatprep.subr.bf16.mxu1 %v2906_v34 }
 0x3d1   : > { %2579 = vmatpush3.bf16.msra.mxu1 %v2907_v38 }
 0x3d4   : > { %2194 = vmatmul.mubr.bf16.vlgmr.msra.gmra.mrb[72].mxu1 %v3546_v13 }
 0x3d5   : > { %2201 = vmatprep.mubr.bf16.mxu1 %v3560_v45 }
 0x3dc   : > { %2202 = vmatmul.mubr.bf16.gmra.mrb[76].mxu1 %v3558_v54 }
 0x3dd   : > { %2209 = vmatprep.mubr.bf16.mxu1 %v3572_v11 }
 0x3e4   : > { %2210 = vmatmul.mubr.bf16.gmra.mrb[80].mxu1 %v3570_v9 }
 0x3e5   : > { %2217 = vmatprep.mubr.bf16.mxu1 %v3584_v44 }
 0x3ec   : > { %2218 = vmatmul.mubr.bf16.gmra.mrb[84].mxu1 %v3582_v43 }
 0x3ed   : > { %2225 = vmatprep.mubr.bf16.mxu1 %v3608_v19 }
 0x3f4   : > { %2226 = vmatmul.mubr.bf16.gmra.mrb[88].mxu1 %v3606_v17 }
 0x3f5   : > { %2233 = vmatprep.mubr.bf16.mxu1 %v1810_v33 }
 0x3fc   : > { %2234 = vmatmul.mubr.bf16.gmra.mrb[92].mxu1 %v1809_v62 }
 0x3fd   : > { %2241 = vmatprep.mubr.bf16.mxu1 %v1814_v29 }
 0x404   : > { %2242 = vmatmul.mubr.bf16.gmra.mrb[96].mxu1 %v1813_v55 }
 0x46f   : > { %v2522_v13 = vpop.f32.mrb[84].mxu0 }
 0x470   : > { %v2523_v15 = vpop.f32.mrb[85].mxu0 }
 0x471   : > { %v2524_v45 = vadd.f32 %v2523_v15, %v2522_v13  ;;  %v2525_v54 = vpop.f32.mrb[86].mxu0 }
 0x472   : > { %v2526_v39 = vpop.f32.mrb[87].mxu0 }
 0x473   : > { %v2527_v11 = vadd.f32 %v2526_v39, %v2525_v54  ;;  %v2107_v16 = vadd.f32 %v2524_v45, %v3688_v10 }
 0x475   : > { %v2110_v22 = vadd.f32 %v2527_v11, %v3688_v10 }
 0x477   : > { %v2528_v40 = vpop.f32.mrb[88].mxu0 }
 0x478   : > { %v2529_v9 = vpop.f32.mrb[89].mxu0 }
 0x479   : > { %v2530_v36 = vadd.f32 %v2529_v9, %v2528_v40  ;;  %v2531_v44 = vpop.f32.mrb[90].mxu0 }
 0x47a   : > { %v2532_v37 = vpop.f32.mrb[91].mxu0 }
 0x47b   : > { %v2533_v43 = vadd.f32 %v2532_v37, %v2531_v44  ;;  %v2115_v26 = vadd.f32 %v2530_v36, %v3688_v10 }
 0x47d   : > { %v2118_v28 = vadd.f32 %v2533_v43, %v3688_v10 }
 0x47f   : > { %v2534_v41 = vpop.f32.mrb[92].mxu0 }
 0x480   : > { %v2535_v19 = vpop.f32.mrb[93].mxu0 }
 0x481   : > { %v2536_v42 = vadd.f32 %v2535_v19, %v2534_v41  ;;  %v2537_v17 = vpop.f32.mrb[94].mxu0 }
 0x482   : > { %v2538_v53 = vpop.f32.mrb[95].mxu0 }
 0x483   : > { %v2539_v46 = vadd.f32 %v2538_v53, %v2537_v17  ;;  %v2123_v15 = vadd.f32 %v2536_v42, %v3688_v10 }
 0x485   : > { %v2126_v11 = vadd.f32 %v2539_v46, %v3688_v10 }
 0x487   : > { %v2540_v47 = vpop.f32.mrb[56].mxu1 }
 0x488   : > { %v2541_v48 = vpop.f32.mrb[57].mxu1 }
 0x489   : > { %v3669_v49 = vadd.f32 %v2541_v48, %v2540_v47  ;;  %v2543_v56 = vpop.f32.mrb[58].mxu1 }
 0x48a   : > { %v2544_v57 = vpop.f32.mrb[59].mxu1 }
 0x48b   : > { %v3671_v58 = vadd.f32 %v2544_v57, %v2543_v56  ;;  %v2131_v43 = vadd.f32 %v3669_v49, %v3688_v10 }
 0x48d   : > { %v2134_v17 = vadd.f32 %v3671_v58, %v3688_v10 }
 0x48f   : > { %v2546_v59 = vpop.f32.mrb[60].mxu1 }
 0x490   : > { %v2547_v60 = vpop.f32.mrb[61].mxu1 }
 0x491   : > { %v3673_v62 = vadd.f32 %v2547_v60, %v2546_v59  ;;  %v2549_v31 = vpop.f32.mrb[62].mxu1 }
 0x492   : > { %v2550_v33 = vpop.f32.mrb[63].mxu1 }
 0x493   : > { %v3675_v63 = vadd.f32 %v2550_v33, %v2549_v31  ;;  %v2139_v57 = vadd.f32 %v3673_v62, %v3688_v10 }
 0x495   : > { %v2142_v31 = vadd.f32 %v3675_v63, %v3688_v10 }
 0x497   : > { %v2552_v0 = vpop.f32.mrb[64].mxu1 }
 0x498   : > { %v2553_v32 = vpop.f32.mrb[65].mxu1 }
 0x499   : > { %v3677_v35 = vadd.f32 %v2553_v32, %v2552_v0  ;;  %v2555_v61 = vpop.f32.mrb[66].mxu1 }
 0x49a   : > { %v2556_v1 = vpop.f32.mrb[67].mxu1 }
 0x49b   : > { %v3679_v2 = vadd.f32 %v2556_v1, %v2555_v61  ;;  %v2147_v1 = vadd.f32 %v3677_v35, %v3688_v10 }
 0x49f   : > { %v2558_v3 = vpop.f32.mrb[68].mxu1 }
 0x4a0   : > { %v2559_v4 = vpop.f32.mrb[69].mxu1 }
 0x4a1   : > { %v3681_v5 = vadd.f32 %v2559_v4, %v2558_v3  ;;  %v2561_v6 = vpop.f32.mrb[70].mxu1 }
 0x4a2   : > { %v2562_v7 = vpop.f32.mrb[71].mxu1 }
 0x4a3   : > { %v3683_v8 = vadd.f32 %v2562_v7, %v2561_v6  ;;  %v2150_v6 = vadd.f32 %v3679_v2, %v3688_v10 }
 0x4a7   : > { %v2580_v12 = vpop.f32.mrb[72].mxu1 }
 0x4a8   : > { %v2581_v14 = vpop.f32.mrb[73].mxu1 }
 0x4a9   : > { %v2582_v18 = vadd.f32 %v2581_v14, %v2580_v12  ;;  %v2583_v20 = vpop.f32.mrb[74].mxu1 }
 0x4aa   : > { %v2584_v21 = vpop.f32.mrb[75].mxu1 }
 0x4ab   : > { %v2196_v23 = vadd.f32 %v2582_v18, %v2107_v16  ;;  %v2585_v24 = vadd.f32 %v2584_v21, %v2583_v20  ;;  %v2155_v18 = vadd.f32 %v3681_v5, %v3688_v10 }
 0x4ad   : > { %2250 = vst [vmem:[%s3695_s11] sm:$0xff] %v2196_v23  ;;  %v2199_v50 = vadd.f32 %v2585_v24, %v2110_v22  ;;  %v2158_v22 = vadd.f32 %v3683_v8, %v3688_v10 }
 0x4af   : > { %2251 = vst [vmem:[%s3695_s11 + $0x8] sm:$0xff] %v2199_v50  ;;  %v2586_v51 = vpop.f32.mrb[76].mxu1 }
 0x4b0   : > { %v2587_v25 = vpop.f32.mrb[77].mxu1 }
 0x4b1   : > { %v2588_v52 = vadd.f32 %v2587_v25, %v2586_v51  ;;  %v2589_v27 = vpop.f32.mrb[78].mxu1 }
 0x4b2   : > { %v2590_v55 = vpop.f32.mrb[79].mxu1 }
 0x4b3   : > { %v2204_v29 = vadd.f32 %v2588_v52, %v2115_v26  ;;  %v2591_v30 = vadd.f32 %v2590_v55, %v2589_v27 }
 0x4b5   : > { %2252 = vst [vmem:[%s3695_s11 + $0x10] sm:$0xff] %v2204_v29  ;;  %v2207_v34 = vadd.f32 %v2591_v30, %v2118_v28 }
 0x4b7   : > { %2253 = vst [vmem:[%s3695_s11 + $0x18] sm:$0xff] %v2207_v34  ;;  %v2592_v38 = vpop.f32.mrb[80].mxu1 }
 0x4b8   : > { %v2593_v13 = vpop.f32.mrb[81].mxu1 }
 0x4b9   : > { %v2594_v45 = vadd.f32 %v2593_v13, %v2592_v38  ;;  %v2595_v54 = vpop.f32.mrb[82].mxu1 }
 0x4ba   : > { %v2596_v39 = vpop.f32.mrb[83].mxu1 }
 0x4bb   : > { %v2212_v40 = vadd.f32 %v2594_v45, %v2123_v15  ;;  %v2597_v9 = vadd.f32 %v2596_v39, %v2595_v54 }
 0x4bd   : > { %2254 = vst [vmem:[%s3695_s11 + $0x20] sm:$0xff] %v2212_v40  ;;  %v2215_v36 = vadd.f32 %v2597_v9, %v2126_v11 }
 0x4bf   : > { %2255 = vst [vmem:[%s3695_s11 + $0x28] sm:$0xff] %v2215_v36  ;;  %v2598_v44 = vpop.f32.mrb[84].mxu1 }
 0x4c0   : > { %v2599_v37 = vpop.f32.mrb[85].mxu1 }
 0x4c1   : > { %v2600_v41 = vadd.f32 %v2599_v37, %v2598_v44  ;;  %v2601_v19 = vpop.f32.mrb[86].mxu1 }
 0x4c2   : > { %v2602_v42 = vpop.f32.mrb[87].mxu1 }
 0x4c3   : > { %v2220_v53 = vadd.f32 %v2600_v41, %v2131_v43  ;;  %v2603_v46 = vadd.f32 %v2602_v42, %v2601_v19 }
 0x4c5   : > { %2256 = vst [vmem:[%s3695_s11 + $0x30] sm:$0xff] %v2220_v53  ;;  %v2223_v47 = vadd.f32 %v2603_v46, %v2134_v17 }
 0x4c7   : > { %2257 = vst [vmem:[%s3695_s11 + $0x38] sm:$0xff] %v2223_v47  ;;  %v2604_v48 = vpop.f32.mrb[88].mxu1 }
 0x4c8   : > { %v2605_v56 = vpop.f32.mrb[89].mxu1 }
 0x4c9   : > { %v2606_v59 = vadd.f32 %v2605_v56, %v2604_v48  ;;  %v2607_v49 = vpop.f32.mrb[90].mxu1 }
 0x4ca   : > { %v2608_v60 = vpop.f32.mrb[91].mxu1 }
 0x4cb   : > { %v2228_v33 = vadd.f32 %v2606_v59, %v2139_v57  ;;  %v2609_v58 = vadd.f32 %v2608_v60, %v2607_v49 }
 0x4cd   : > { %2258 = vst [vmem:[%s3695_s11 + $0x40] sm:$0xff] %v2228_v33  ;;  %v2231_v0 = vadd.f32 %v2609_v58, %v2142_v31 }
 0x4cf   : > { %2259 = vst [vmem:[%s3695_s11 + $0x48] sm:$0xff] %v2231_v0  ;;  %v2610_v32 = vpop.f32.mrb[92].mxu1 }
 0x4d0   : > { %v2611_v61 = vpop.f32.mrb[93].mxu1 }
 0x4d1   : > { %v2612_v3 = vadd.f32 %v2611_v61, %v2610_v32  ;;  %v2613_v62 = vpop.f32.mrb[94].mxu1 }
 0x4d2   : > { %v2614_v4 = vpop.f32.mrb[95].mxu1 }
 0x4d3   : > { %v2236_v7 = vadd.f32 %v2612_v3, %v2147_v1  ;;  %v2615_v63 = vadd.f32 %v2614_v4, %v2613_v62 }
 0x4d5   : > { %2260 = vst [vmem:[%s3695_s11 + $0x50] sm:$0xff] %v2236_v7  ;;  %v2239_v12 = vadd.f32 %v2615_v63, %v2150_v6 }
 0x4d7   : > { %2261 = vst [vmem:[%s3695_s11 + $0x58] sm:$0xff] %v2239_v12  ;;  %v2616_v14 = vpop.f32.mrb[96].mxu1 }
 0x4d8   : > { %v2617_v16 = vpop.f32.mrb[97].mxu1 }
 0x4d9   : > { %v2618_v20 = vadd.f32 %v2617_v16, %v2616_v14  ;;  %v2619_v35 = vpop.f32.mrb[98].mxu1 }
 0x4da   : > { %v2620_v21 = vpop.f32.mrb[99].mxu1 }
 0x4db   : > { %v2244_v23 = vadd.f32 %v2618_v20, %v2155_v18  ;;  %v2621_v24 = vadd.f32 %v2620_v21, %v2619_v35 }
 0x4dd   : > { %2262 = vst [vmem:[%s3695_s11 + $0x60] sm:$0xff] %v2244_v23  ;;  %v2247_v2 = vadd.f32 %v2621_v24, %v2158_v22 }
 0x4df   : > { %2263 = vst [vmem:[%s3695_s11 + $0x68] sm:$0xff] %v2247_v2 }
 0x4e0 PF: > { %s17_s24 = sadd.s32 1, %s2914_s24  }
 0x4e1   : > { %p14_p4 = scmp.ge.s32.totalorder %s17_s24, 4  }
 0x4e3   :  { %16 = sbr.rel (!%p14_p4) target bundleno = 1 (0x1), region = 81 }

</bundles_post_ra>
